<compile_context>
chip_gen: v5e
topology: v5e:2x2
jax: 0.10.0
libtpu: 0.0.40
codegen_flags: <defaults>
</compile_context>

<pallas_src>
import jax
import jax.numpy as jnp
from jax.experimental import pallas as pl
from jax.experimental.pallas import tpu as pltpu

MXU_DTYPE = jnp.bfloat16
VMEM_LIMIT = 48 * 1024 * 1024   # v7x-safe; v5e/v6e can go higher (128 MiB phys)


def _cparams(dimension_semantics):
    return pltpu.CompilerParams(dimension_semantics=dimension_semantics,
                                vmem_limit_bytes=VMEM_LIMIT)


def _row_tile(n, cap=256):
    """Largest multiple-of-8 divisor of n that is <= cap (sublane aligned)."""
    for t in range(min(n, cap), 7, -1):
        if t % 8 == 0 and n % t == 0:
            return t
    return n


def _k_tile(n, cap=512):
    """Lane (last-dim) tile for the adjacency: multiple of 128, or full n."""
    if n % 128 == 0:
        for t in range(min(n, cap), 127, -128):
            if n % t == 0:
                return t
    return n


# -------------------- Stage 0: stacked feature projection -------------------
def proj_kernel(x_ref, w_ref, o_ref):
    """o = x @ [W1_0 | ... | W1_{V-1}]  (one wide matmul for all views)."""
    o_ref[...] = jnp.dot(x_ref[...], w_ref[...],
                         preferred_element_type=jnp.float32).astype(o_ref.dtype)


# -------------------- Stage 1: A @ XW  (+bias, relu) then @ W2 --------------
def make_agg_project_kernel(num_views, h1, h2):
    def kernel(*refs):
        a_refs = refs[:num_views]
        xw_ref, b1_ref, w2_ref, o_ref, acc_ref = refs[num_views:]
        k = pl.program_id(1)

        @pl.when(k == 0)
        def _():
            acc_ref[...] = jnp.zeros_like(acc_ref)

        xw = xw_ref[...]                                      # bf16 (tk, V*H1)
        for v in range(num_views):
            acc_ref[:, v * h1:(v + 1) * h1] += jnp.dot(
                a_refs[v][...], xw[:, v * h1:(v + 1) * h1],
                preferred_element_type=jnp.float32)

        @pl.when(k == pl.num_programs(1) - 1)
        def _():
            h = jnp.maximum(acc_ref[...] + b1_ref[...], 0.0)  # f32 (tm, V*H1)
            for v in range(num_views):
                o_ref[:, v * h2:(v + 1) * h2] = jnp.dot(
                    h[:, v * h1:(v + 1) * h1].astype(MXU_DTYPE), w2_ref[v],
                    preferred_element_type=jnp.float32).astype(o_ref.dtype)

    return kernel


# -------------------- Stage 2: A @ HW (+bias, relu) + attention fusion ------
def make_agg_attention_kernel(num_views, h2):
    def kernel(*refs):
        a_refs = refs[:num_views]
        (hw_ref, b2_ref, wa1_ref, ba1_ref, wa2_ref,
         o_ref, acc_ref) = refs[num_views:]
        k = pl.program_id(1)

        @pl.when(k == 0)
        def _():
            acc_ref[...] = jnp.zeros_like(acc_ref)

        hw = hw_ref[...]                                      # bf16 (tk, V*H2)
        for v in range(num_views):
            acc_ref[:, v * h2:(v + 1) * h2] += jnp.dot(
                a_refs[v][...], hw[:, v * h2:(v + 1) * h2],
                preferred_element_type=jnp.float32)

        @pl.when(k == pl.num_programs(1) - 1)
        def _():
            z = jnp.maximum(acc_ref[...] + b2_ref[...], 0.0)  # f32 (tm, V*H2)
            wa1, ba1, wa2 = wa1_ref[...], ba1_ref[...], wa2_ref[...]
            zs, scores = [], []
            for v in range(num_views):
                zv = z[:, v * h2:(v + 1) * h2]
                zs.append(zv)
                hv = jnp.tanh(jnp.dot(zv.astype(MXU_DTYPE), wa1,
                                      preferred_element_type=jnp.float32) + ba1)
                # score via VPU reduction instead of a 1-lane-output matmul
                scores.append(jnp.sum(hv * wa2, axis=-1, keepdims=True))
            m = scores[0]
            for s in scores[1:]:
                m = jnp.maximum(m, s)
            exps = [jnp.exp(s - m) for s in scores]
            denom = exps[0]
            for e in exps[1:]:
                denom = denom + e
            inv = pl.reciprocal(denom, approx=True)           # one EUP op
            out = (exps[0] * inv) * zs[0]
            for e, zv in zip(exps[1:], zs[1:]):
                out = out + (e * inv) * zv
            o_ref[...] = out.astype(o_ref.dtype)

    return kernel


# -------------------- Decoder: pair gather + split-weight MLP ---------------
def decoder_kernel(im_ref, id_ref, zm_ref, zd_ref,
                   w1a_ref, w1b_ref, w1c_ref, w1d_ref,
                   b1_ref, w2_ref, b2_ref, o_ref):
    tp = im_ref.shape[0]
    nm = zm_ref.shape[0]
    nd = zd_ref.shape[0]
    # bf16 one-hot gather bounded to this pair block (not a full (P, N) f32).
    # TODO(synk): swap for a DMA row gather (scalar prefetch + async copies).
    sel_m = (jax.lax.broadcasted_iota(jnp.int32, (tp, nm), 1)
             == im_ref[...]).astype(MXU_DTYPE)
    sel_d = (jax.lax.broadcasted_iota(jnp.int32, (tp, nd), 1)
             == id_ref[...]).astype(MXU_DTYPE)
    e1 = jnp.dot(sel_m, zm_ref[...], preferred_element_type=jnp.float32)
    e2 = jnp.dot(sel_d, zd_ref[...], preferred_element_type=jnp.float32)

    # decoder1 on [e1+e2 | e1*e2 | e1 | e2] WITHOUT a lane concat:
    # the (4*H2, D1) weight is pre-split into four (H2, D1) row blocks.
    h = (jnp.dot((e1 + e2).astype(MXU_DTYPE), w1a_ref[...],
                 preferred_element_type=jnp.float32)
         + jnp.dot((e1 * e2).astype(MXU_DTYPE), w1b_ref[...],
                   preferred_element_type=jnp.float32)
         + jnp.dot(e1.astype(MXU_DTYPE), w1c_ref[...],
                   preferred_element_type=jnp.float32)
         + jnp.dot(e2.astype(MXU_DTYPE), w1d_ref[...],
                   preferred_element_type=jnp.float32)
         + b1_ref[...])
    h = jnp.maximum(h, 0.0)
    # final (D1, 1) projection as a VPU reduction (no 1-lane matmul)
    o_ref[...] = jnp.sum(h * w2_ref[...], axis=-1, keepdims=True) + b2_ref[...]


# -------------------- Wrappers ----------------------------------------------
def branch_forward(a_list, x, bp):
    """All GCN views (2 layers) of one branch + attention fusion, tiled."""
    num_views = len(a_list)
    n, f = x.shape
    h1 = bp["w2"].shape[1]
    h2 = bp["w2"].shape[2]
    att = bp["wa1"].shape[1]
    tm = _row_tile(n)
    tk = _k_tile(n)
    ni, nk = n // tm, n // tk

    def full(*shape):   # whole-array resident operand (weights / biases)
        return pl.BlockSpec(shape, lambda i, k: (0,) * len(shape))

    # Stage 0: XW = X @ W1_stacked  (once for all views)
    xw = pl.pallas_call(
        proj_kernel,
        out_shape=jax.ShapeDtypeStruct((n, num_views * h1), MXU_DTYPE),
        grid=(ni,),
        in_specs=[pl.BlockSpec((tm, f), lambda i: (i, 0)),
                  pl.BlockSpec((f, num_views * h1), lambda i: (0, 0))],
        out_specs=pl.BlockSpec((tm, num_views * h1), lambda i: (i, 0)),
        compiler_params=_cparams(("parallel",)),
    )(x, bp["w1"])

    # Stage 1: HW_v = relu(A_v @ XW_v + b1_v) @ W2_v   (row x K tiled)
    hw = pl.pallas_call(
        make_agg_project_kernel(num_views, h1, h2),
        out_shape=jax.ShapeDtypeStruct((n, num_views * h2), MXU_DTYPE),
        grid=(ni, nk),
        in_specs=([pl.BlockSpec((tm, tk), lambda i, k: (i, k))
                   for _ in range(num_views)]
                  + [pl.BlockSpec((tk, num_views * h1), lambda i, k: (k, 0)),
                     full(1, num_views * h1),
                     full(num_views, h1, h2)]),
        out_specs=pl.BlockSpec((tm, num_views * h2), lambda i, k: (i, 0)),
        scratch_shapes=[pltpu.VMEM((tm, num_views * h1), jnp.float32)],
        compiler_params=_cparams(("parallel", "arbitrary")),
    )(*a_list, xw, bp["b1"], bp["w2"])

    # Stage 2: z_v = relu(A_v @ HW_v + b2_v); fused = attention(z_0..z_{V-1})
    fused = pl.pallas_call(
        make_agg_attention_kernel(num_views, h2),
        out_shape=jax.ShapeDtypeStruct((n, h2), MXU_DTYPE),
        grid=(ni, nk),
        in_specs=([pl.BlockSpec((tm, tk), lambda i, k: (i, k))
                   for _ in range(num_views)]
                  + [pl.BlockSpec((tk, num_views * h2), lambda i, k: (k, 0)),
                     full(1, num_views * h2),
                     full(h2, att),
                     full(1, att),
                     full(1, att)]),
        out_specs=pl.BlockSpec((tm, h2), lambda i, k: (i, 0)),
        scratch_shapes=[pltpu.VMEM((tm, num_views * h2), jnp.float32)],
        compiler_params=_cparams(("parallel", "arbitrary")),
    )(*a_list, hw, bp["b2"], bp["wa1"], bp["ba1"], bp["wa2"])
    return fused


def decoder_forward(z_m, z_d, idx_m, idx_d, dp):
    p = idx_m.shape[0]
    nm, h2 = z_m.shape
    nd = z_d.shape[0]
    d1 = dp["b1"].shape[1]
    tp = _row_tile(p)

    def full(*shape):
        return pl.BlockSpec(shape, lambda i: (0,) * len(shape))

    return pl.pallas_call(
        decoder_kernel,
        out_shape=jax.ShapeDtypeStruct((p, 1), jnp.float32),
        grid=(p // tp,),
        in_specs=[pl.BlockSpec((tp, 1), lambda i: (i, 0)),
                  pl.BlockSpec((tp, 1), lambda i: (i, 0)),
                  full(nm, h2), full(nd, h2),
                  full(h2, d1), full(h2, d1), full(h2, d1), full(h2, d1),
                  full(1, d1), full(1, d1), full(1, 1)],
        out_specs=pl.BlockSpec((tp, 1), lambda i: (i, 0)),
        compiler_params=_cparams(("parallel",)),
    )(idx_m, idx_d, z_m, z_d,
      dp["w1a"], dp["w1b"], dp["w1c"], dp["w1d"],
      dp["b1"], dp["w2"], dp["b2"])


def mgcna_forward(pp, adjs, x_m, x_d, idx_m, idx_d):
    # miRNA branch: views (s, r); drug branch: views (f, g, m)
    x_m_fused = branch_forward([adjs["mm_s"], adjs["mm_r"]], x_m, pp["m"])
    y_d_fused = branch_forward([adjs["dd_f"], adjs["dd_g"], adjs["dd_m"]],
                               x_d, pp["d"])
    return decoder_forward(x_m_fused, y_d_fused, idx_m, idx_d, pp["dec"])


# -------------------- Host-side setup (outside jit) --------------------------
def normalized_adj(key, n, num_edges):
    """Dense GCN-normalized adjacency: D^{-1/2} (A + I) D^{-1/2}."""
    ksrc, kdst = jax.random.split(key)
    src = jax.random.randint(ksrc, (num_edges,), 0, n)
    dst = jax.random.randint(kdst, (num_edges,), 0, n)
    a = jnp.zeros((n, n), jnp.float32).at[src, dst].set(1.0)
    a = jnp.maximum(a, a.T)
    a = jnp.minimum(a + jnp.eye(n, dtype=jnp.float32), 1.0)
    deg = a.sum(axis=1)
    dinv = 1.0 / jnp.sqrt(deg)
    return a * dinv[:, None] * dinv[None, :]


def init_params(key, feature, hidden1, hidden2, decoder1, att_hidden=128):
    keys = iter(jax.random.split(key, 64))

    def lin_w(in_d, out_d):
        return (jax.random.normal(next(keys), (in_d, out_d), jnp.float32)
                * (1.0 / jnp.sqrt(in_d)))

    def lin_b(out_d):
        return jax.random.normal(next(keys), (out_d,), jnp.float32) * 0.01

    p = {}
    for name in ["x1_s", "x1_g", "x1_r", "y1_f", "y1_g", "y1_m"]:
        p[f"gcn_{name}_w"] = lin_w(feature, hidden1)
        p[f"gcn_{name}_b"] = lin_b(hidden1)
    for name in ["x2_s", "x2_g", "x2_r", "y2_f", "y2_g", "y2_m"]:
        p[f"gcn_{name}_w"] = lin_w(hidden1, hidden2)
        p[f"gcn_{name}_b"] = lin_b(hidden2)
    for name in ["att_m", "att_d"]:
        p[f"{name}_w1"] = lin_w(hidden2, att_hidden)
        p[f"{name}_b1"] = lin_b(att_hidden)
        p[f"{name}_w2"] = lin_w(att_hidden, 1)      # Linear(h, 1, bias=False)
    p["dec1_w"] = lin_w(hidden2 * 4, decoder1)
    p["dec1_b"] = lin_b(decoder1)
    p["dec2_w"] = lin_w(decoder1, 1)
    p["dec2_b"] = lin_b(1)
    return p


def pack_params(params):
    """Pre-stack / pre-split / pre-cast all parameters ONCE on the host."""
    def bf(a):
        return a.astype(MXU_DTYPE)

    def branch(l1_names, l2_names, att_name):
        w1 = jnp.concatenate([params[f"gcn_{n}_w"] for n in l1_names], axis=1)
        b1 = jnp.concatenate([params[f"gcn_{n}_b"] for n in l1_names]).reshape(1, -1)
        w2 = jnp.stack([params[f"gcn_{n}_w"] for n in l2_names], axis=0)
        b2 = jnp.concatenate([params[f"gcn_{n}_b"] for n in l2_names]).reshape(1, -1)
        return dict(
            w1=bf(w1), b1=b1, w2=bf(w2), b2=b2,
            wa1=bf(params[f"{att_name}_w1"]),
            ba1=params[f"{att_name}_b1"].reshape(1, -1),
            wa2=params[f"{att_name}_w2"].reshape(1, -1),
        )

    h2 = params["gcn_x2_s_w"].shape[1]
    w1 = params["dec1_w"]
    dec = dict(
        w1a=bf(w1[0 * h2:1 * h2]), w1b=bf(w1[1 * h2:2 * h2]),
        w1c=bf(w1[2 * h2:3 * h2]), w1d=bf(w1[3 * h2:4 * h2]),
        b1=params["dec1_b"].reshape(1, -1),
        w2=params["dec2_w"].reshape(1, -1),
        b2=params["dec2_b"].reshape(1, -1),
    )
    return {
        "m": branch(["x1_s", "x1_r"], ["x2_s", "x2_r"], "att_m"),
        "d": branch(["y1_f", "y1_g", "y1_m"], ["y2_f", "y2_g", "y2_m"], "att_d"),
        "dec": dec,
    }


if __name__ == "__main__":
    # small synthetic config (mirrors args.miRNA_number / args.drug_number /
    # args.dimensions and the MGCNA hyperparameters)
    miRNA_number = 16
    drug_number = 24
    feature = 32
    hidden1 = 32
    hidden2 = 32
    decoder1 = 64
    n_pairs = 8

    root = jax.random.PRNGKey(0)
    k_feat_m, k_feat_d, k_adj, k_param, k_idx = jax.random.split(root, 5)

    # node features (replaces torch.manual_seed(1); torch.randn(...))
    x_m = jax.random.normal(k_feat_m, (miRNA_number, feature), jnp.float32)
    x_d = jax.random.normal(k_feat_d, (drug_number, feature), jnp.float32)

    # dense normalized adjacencies for each graph view (edge lists -> dense)
    ka = jax.random.split(k_adj, 5)
    adjs = {
        "mm_s": normalized_adj(ka[0], miRNA_number, 40),
        "mm_r": normalized_adj(ka[1], miRNA_number, 40),
        "dd_f": normalized_adj(ka[2], drug_number, 60),
        "dd_g": normalized_adj(ka[3], drug_number, 60),
        "dd_m": normalized_adj(ka[4], drug_number, 60),
    }

    params = init_params(k_param, feature, hidden1, hidden2, decoder1)

    ki0, ki1 = jax.random.split(k_idx)
    idx_m = jax.random.randint(ki0, (n_pairs, 1), 0, miRNA_number,
                               dtype=jnp.int32)
    idx_d = jax.random.randint(ki1, (n_pairs, 1), 0, drug_number,
                               dtype=jnp.int32)

    # pre-cast all MXU operands to bf16 ONCE, outside the jitted forward
    packed = pack_params(params)
    adjs_bf16 = {k: v.astype(MXU_DTYPE) for k, v in adjs.items()}
    x_m_bf16 = x_m.astype(MXU_DTYPE)
    x_d_bf16 = x_d.astype(MXU_DTYPE)

    fwd = jax.jit(mgcna_forward)
    out = jax.block_until_ready(
        fwd(packed, adjs_bf16, x_m_bf16, x_d_bf16, idx_m, idx_d))
    assert out.shape == (n_pairs, 1), out.shape
    assert bool(jnp.all(jnp.isfinite(out)))
    print("KERNEL_OK")
</pallas_src>

<mosaic_0001>
module attributes {stable_mosaic.version = 11 : i64} {
  func.func @kernel(%arg0: i32, %arg1: i32, %arg2: memref<24x24xbf16, #tpu.memory_space<vmem>>, %arg3: memref<24x24xbf16, #tpu.memory_space<vmem>>, %arg4: memref<24x24xbf16, #tpu.memory_space<vmem>>, %arg5: memref<24x96xbf16, #tpu.memory_space<vmem>>, %arg6: memref<1x96xf32, #tpu.memory_space<vmem>>, %arg7: memref<32x128xbf16, #tpu.memory_space<vmem>>, %arg8: memref<1x128xf32, #tpu.memory_space<vmem>>, %arg9: memref<1x128xf32, #tpu.memory_space<vmem>>, %arg10: memref<24x32xbf16, #tpu.memory_space<vmem>>, %arg11: memref<24x96xf32, #tpu.memory_space<vmem>>) attributes {dimension_semantics = [#tpu.dimension_semantics<parallel>, #tpu.dimension_semantics<arbitrary>], iteration_bounds = array<i64: 1, 1>, scalar_prefetch = 0 : i64, scratch_operands = 1 : i64, tpu.core_type = #tpu.core_type<tc>, window_params = [{transform_indices = @transform_0, window_bounds = array<i64: 24, 24>}, {transform_indices = @transform_1, window_bounds = array<i64: 24, 24>}, {transform_indices = @transform_2, window_bounds = array<i64: 24, 24>}, {transform_indices = @transform_3, window_bounds = array<i64: 24, 96>}, {pipeline_mode = #tpu.pipeline_mode<synchronous>, transform_indices = @transform_4, window_bounds = array<i64: 1, 96>}, {pipeline_mode = #tpu.pipeline_mode<synchronous>, transform_indices = @transform_5, window_bounds = array<i64: 32, 128>}, {pipeline_mode = #tpu.pipeline_mode<synchronous>, transform_indices = @transform_6, window_bounds = array<i64: 1, 128>}, {pipeline_mode = #tpu.pipeline_mode<synchronous>, transform_indices = @transform_7, window_bounds = array<i64: 1, 128>}, {transform_indices = @transform_8, window_bounds = array<i64: 24, 32>}]} {
    %c0_i32 = arith.constant 0 : i32
    %0 = arith.cmpi eq, %arg1, %c0_i32 : i32
    %1 = arith.extui %0 : i1 to i32
    %c0_i32_0 = arith.constant 0 : i32
    %2 = arith.cmpi ne, %1, %c0_i32_0 : i32
    scf.if %2 {
      %cst_22 = arith.constant 0.000000e+00 : f32
      %25 = vector.broadcast %cst_22 : f32 to vector<24x96xf32>
      %c0_23 = arith.constant 0 : index
      %c0_24 = arith.constant 0 : index
      %26 = vector.load %arg11[%c0_23, %c0_24] : memref<24x96xf32, #tpu.memory_space<vmem>>, vector<24x96xf32>
      tpu.vector_store %arg11[%c0_23, %c0_24], %25 {strides = array<i32>} : memref<24x96xf32, #tpu.memory_space<vmem>>, vector<24x96xf32>,
    } else {
    }
    %c0 = arith.constant 0 : index
    %c0_1 = arith.constant 0 : index
    %3 = vector.load %arg5[%c0, %c0_1] : memref<24x96xbf16, #tpu.memory_space<vmem>>, vector<24x96xbf16>
    %c0_2 = arith.constant 0 : index
    %c0_3 = arith.constant 0 : index
    %4 = vector.load %arg11[%c0_2, %c0_3] : memref<24x96xf32, #tpu.memory_space<vmem>>, vector<24x32xf32>
    %c0_4 = arith.constant 0 : index
    %c0_5 = arith.constant 0 : index
    %5 = vector.load %arg2[%c0_4, %c0_5] : memref<24x24xbf16, #tpu.memory_space<vmem>>, vector<24x24xbf16>
    %6 = vector.extract_strided_slice %3 {offsets = [0, 0], sizes = [24, 32], strides = [1, 1]} : vector<24x96xbf16> to vector<24x32xbf16>
    %cst = arith.constant dense<0.000000e+00> : vector<24x32xf32>
    %7 = tpu.matmul %5, %6, %cst {dimension_numbers = #tpu.dot_dimension_numbers<[1], [0], [0], [1], [0, 0, 1, 1], [], []>} : vector<24x24xbf16>, vector<24x32xbf16>, vector<24x32xf32> -> vector<24x32xf32>
    %8 = arith.addf %4, %7 : vector<24x32xf32>
    %c0_6 = arith.constant 0 : index
    %c0_7 = arith.constant 0 : index
    %9 = vector.load %arg11[%c0_6, %c0_7] : memref<24x96xf32, #tpu.memory_space<vmem>>, vector<24x32xf32>
    tpu.vector_store %arg11[%c0_6, %c0_7], %8 {strides = array<i32>} : memref<24x96xf32, #tpu.memory_space<vmem>>, vector<24x32xf32>,
    %c0_8 = arith.constant 0 : index
    %c32 = arith.constant 32 : index
    %10 = vector.load %arg11[%c0_8, %c32] : memref<24x96xf32, #tpu.memory_space<vmem>>, vector<24x32xf32>
    %c0_9 = arith.constant 0 : index
    %c0_10 = arith.constant 0 : index
    %11 = vector.load %arg3[%c0_9, %c0_10] : memref<24x24xbf16, #tpu.memory_space<vmem>>, vector<24x24xbf16>
    %12 = vector.extract_strided_slice %3 {offsets = [0, 32], sizes = [24, 32], strides = [1, 1]} : vector<24x96xbf16> to vector<24x32xbf16>
    %cst_11 = arith.constant dense<0.000000e+00> : vector<24x32xf32>
    %13 = tpu.matmul %11, %12, %cst_11 {dimension_numbers = #tpu.dot_dimension_numbers<[1], [0], [0], [1], [0, 0, 1, 1], [], []>} : vector<24x24xbf16>, vector<24x32xbf16>, vector<24x32xf32> -> vector<24x32xf32>
    %14 = arith.addf %10, %13 : vector<24x32xf32>
    %c0_12 = arith.constant 0 : index
    %c32_13 = arith.constant 32 : index
    %15 = vector.load %arg11[%c0_12, %c32_13] : memref<24x96xf32, #tpu.memory_space<vmem>>, vector<24x32xf32>
    tpu.vector_store %arg11[%c0_12, %c32_13], %14 {strides = array<i32>} : memref<24x96xf32, #tpu.memory_space<vmem>>, vector<24x32xf32>,
    %c0_14 = arith.constant 0 : index
    %c64 = arith.constant 64 : index
    %16 = vector.load %arg11[%c0_14, %c64] : memref<24x96xf32, #tpu.memory_space<vmem>>, vector<24x32xf32>
    %c0_15 = arith.constant 0 : index
    %c0_16 = arith.constant 0 : index
    %17 = vector.load %arg4[%c0_15, %c0_16] : memref<24x24xbf16, #tpu.memory_space<vmem>>, vector<24x24xbf16>
    %18 = vector.extract_strided_slice %3 {offsets = [0, 64], sizes = [24, 32], strides = [1, 1]} : vector<24x96xbf16> to vector<24x32xbf16>
    %cst_17 = arith.constant dense<0.000000e+00> : vector<24x32xf32>
    %19 = tpu.matmul %17, %18, %cst_17 {dimension_numbers = #tpu.dot_dimension_numbers<[1], [0], [0], [1], [0, 0, 1, 1], [], []>} : vector<24x24xbf16>, vector<24x32xbf16>, vector<24x32xf32> -> vector<24x32xf32>
    %20 = arith.addf %16, %19 : vector<24x32xf32>
    %c0_18 = arith.constant 0 : index
    %c64_19 = arith.constant 64 : index
    %21 = vector.load %arg11[%c0_18, %c64_19] : memref<24x96xf32, #tpu.memory_space<vmem>>, vector<24x32xf32>
    tpu.vector_store %arg11[%c0_18, %c64_19], %20 {strides = array<i32>} : memref<24x96xf32, #tpu.memory_space<vmem>>, vector<24x32xf32>,
    %c0_i32_20 = arith.constant 0 : i32
    %22 = arith.cmpi eq, %arg1, %c0_i32_20 : i32
    %23 = arith.extui %22 : i1 to i32
    %c0_i32_21 = arith.constant 0 : i32
    %24 = arith.cmpi ne, %23, %c0_i32_21 : i32
    scf.if %24 {
      %c0_22 = arith.constant 0 : index
      %c0_23 = arith.constant 0 : index
      %25 = vector.load %arg11[%c0_22, %c0_23] : memref<24x96xf32, #tpu.memory_space<vmem>>, vector<24x96xf32>
      %c0_24 = arith.constant 0 : index
      %c0_25 = arith.constant 0 : index
      %26 = vector.load %arg6[%c0_24, %c0_25] : memref<1x96xf32, #tpu.memory_space<vmem>>, vector<1x96xf32>
      %27 = vector.broadcast %26 : vector<1x96xf32> to vector<24x96xf32>
      %28 = arith.addf %25, %27 : vector<24x96xf32>
      %cst_26 = arith.constant 0.000000e+00 : f32
      %29 = vector.broadcast %cst_26 : f32 to vector<24x96xf32>
      %30 = arith.maximumf %28, %29 : vector<24x96xf32>
      %c0_27 = arith.constant 0 : index
      %c0_28 = arith.constant 0 : index
      %31 = vector.load %arg7[%c0_27, %c0_28] : memref<32x128xbf16, #tpu.memory_space<vmem>>, vector<32x128xbf16>
      %c0_29 = arith.constant 0 : index
      %c0_30 = arith.constant 0 : index
      %32 = vector.load %arg8[%c0_29, %c0_30] : memref<1x128xf32, #tpu.memory_space<vmem>>, vector<1x128xf32>
      %c0_31 = arith.constant 0 : index
      %c0_32 = arith.constant 0 : index
      %33 = vector.load %arg9[%c0_31, %c0_32] : memref<1x128xf32, #tpu.memory_space<vmem>>, vector<1x128xf32>
      %34 = vector.extract_strided_slice %30 {offsets = [0, 0], sizes = [24, 32], strides = [1, 1]} : vector<24x96xf32> to vector<24x32xf32>
      %35 = arith.truncf %34 : vector<24x32xf32> to vector<24x32xbf16>
      %cst_33 = arith.constant dense<0.000000e+00> : vector<24x128xf32>
      %36 = tpu.matmul %35, %31, %cst_33 {dimension_numbers = #tpu.dot_dimension_numbers<[1], [0], [0], [1], [0, 0, 1, 1], [], []>} : vector<24x32xbf16>, vector<32x128xbf16>, vector<24x128xf32> -> vector<24x128xf32>
      %37 = vector.broadcast %32 : vector<1x128xf32> to vector<24x128xf32>
      %38 = arith.addf %36, %37 : vector<24x128xf32>
      %39 = math.tanh %38 : vector<24x128xf32>
      %40 = vector.broadcast %33 : vector<1x128xf32> to vector<24x128xf32>
      %41 = arith.mulf %39, %40 : vector<24x128xf32>
      %cst_34 = arith.constant dense<0.000000e+00> : vector<24xf32>
      %42 = vector.multi_reduction <add>, %41, %cst_34 [1] : vector<24x128xf32> to vector<24xf32>
      %43 = vector.shape_cast %42 : vector<24xf32> to vector<24x1xf32>
      %44 = vector.extract_strided_slice %30 {offsets = [0, 32], sizes = [24, 32], strides = [1, 1]} : vector<24x96xf32> to vector<24x32xf32>
      %45 = arith.truncf %44 : vector<24x32xf32> to vector<24x32xbf16>
      %cst_35 = arith.constant dense<0.000000e+00> : vector<24x128xf32>
      %46 = tpu.matmul %45, %31, %cst_35 {dimension_numbers = #tpu.dot_dimension_numbers<[1], [0], [0], [1], [0, 0, 1, 1], [], []>} : vector<24x32xbf16>, vector<32x128xbf16>, vector<24x128xf32> -> vector<24x128xf32>
      %47 = vector.broadcast %32 : vector<1x128xf32> to vector<24x128xf32>
      %48 = arith.addf %46, %47 : vector<24x128xf32>
      %49 = math.tanh %48 : vector<24x128xf32>
      %50 = vector.broadcast %33 : vector<1x128xf32> to vector<24x128xf32>
      %51 = arith.mulf %49, %50 : vector<24x128xf32>
      %cst_36 = arith.constant dense<0.000000e+00> : vector<24xf32>
      %52 = vector.multi_reduction <add>, %51, %cst_36 [1] : vector<24x128xf32> to vector<24xf32>
      %53 = vector.shape_cast %52 : vector<24xf32> to vector<24x1xf32>
      %54 = vector.extract_strided_slice %30 {offsets = [0, 64], sizes = [24, 32], strides = [1, 1]} : vector<24x96xf32> to vector<24x32xf32>
      %55 = arith.truncf %54 : vector<24x32xf32> to vector<24x32xbf16>
      %cst_37 = arith.constant dense<0.000000e+00> : vector<24x128xf32>
      %56 = tpu.matmul %55, %31, %cst_37 {dimension_numbers = #tpu.dot_dimension_numbers<[1], [0], [0], [1], [0, 0, 1, 1], [], []>} : vector<24x32xbf16>, vector<32x128xbf16>, vector<24x128xf32> -> vector<24x128xf32>
      %57 = vector.broadcast %32 : vector<1x128xf32> to vector<24x128xf32>
      %58 = arith.addf %56, %57 : vector<24x128xf32>
      %59 = math.tanh %58 : vector<24x128xf32>
      %60 = vector.broadcast %33 : vector<1x128xf32> to vector<24x128xf32>
      %61 = arith.mulf %59, %60 : vector<24x128xf32>
      %cst_38 = arith.constant dense<0.000000e+00> : vector<24xf32>
      %62 = vector.multi_reduction <add>, %61, %cst_38 [1] : vector<24x128xf32> to vector<24xf32>
      %63 = vector.shape_cast %62 : vector<24xf32> to vector<24x1xf32>
      %64 = arith.maximumf %43, %53 : vector<24x1xf32>
      %65 = arith.maximumf %64, %63 : vector<24x1xf32>
      %66 = arith.subf %43, %65 : vector<24x1xf32>
      %67 = math.exp %66 : vector<24x1xf32>
      %68 = arith.subf %53, %65 : vector<24x1xf32>
      %69 = math.exp %68 : vector<24x1xf32>
      %70 = arith.subf %63, %65 : vector<24x1xf32>
      %71 = math.exp %70 : vector<24x1xf32>
      %72 = arith.addf %67, %69 : vector<24x1xf32>
      %73 = arith.addf %72, %71 : vector<24x1xf32>
      %74 = tpu.reciprocal %73 {approx = true} : vector<24x1xf32> -> vector<24x1xf32>
      %75 = arith.mulf %67, %74 : vector<24x1xf32>
      %76 = vector.broadcast %75 : vector<24x1xf32> to vector<24x32xf32>
      %77 = arith.mulf %76, %34 : vector<24x32xf32>
      %78 = arith.mulf %69, %74 : vector<24x1xf32>
      %79 = vector.broadcast %78 : vector<24x1xf32> to vector<24x32xf32>
      %80 = arith.mulf %79, %44 : vector<24x32xf32>
      %81 = arith.addf %77, %80 : vector<24x32xf32>
      %82 = arith.mulf %71, %74 : vector<24x1xf32>
      %83 = vector.broadcast %82 : vector<24x1xf32> to vector<24x32xf32>
      %84 = arith.mulf %83, %54 : vector<24x32xf32>
      %85 = arith.addf %81, %84 : vector<24x32xf32>
      %86 = arith.truncf %85 : vector<24x32xf32> to vector<24x32xbf16>
      %c0_39 = arith.constant 0 : index
      %c0_40 = arith.constant 0 : index
      %87 = vector.load %arg10[%c0_39, %c0_40] : memref<24x32xbf16, #tpu.memory_space<vmem>>, vector<24x32xbf16>
      tpu.vector_store %arg10[%c0_39, %c0_40], %86 {strides = array<i32>} : memref<24x32xbf16, #tpu.memory_space<vmem>>, vector<24x32xbf16>,
    } else {
    }
    return
  }
  func.func @transform_0(%arg0: i32, %arg1: i32) -> (i32, i32) {
    %c0_i32 = arith.constant 0 : i32
    return %arg0, %arg1 : i32, i32
  }
  func.func @transform_1(%arg0: i32, %arg1: i32) -> (i32, i32) {
    %c0_i32 = arith.constant 0 : i32
    return %arg0, %arg1 : i32, i32
  }
  func.func @transform_2(%arg0: i32, %arg1: i32) -> (i32, i32) {
    %c0_i32 = arith.constant 0 : i32
    return %arg0, %arg1 : i32, i32
  }
  func.func @transform_3(%arg0: i32, %arg1: i32) -> (i32, i32) {
    %c0_i32 = arith.constant 0 : i32
    %c0_i32_0 = arith.constant 0 : i32
    return %arg1, %c0_i32 : i32, i32
  }
  func.func @transform_4(%arg0: i32, %arg1: i32) -> (i32, i32) {
    %c0_i32 = arith.constant 0 : i32
    %c0_i32_0 = arith.constant 0 : i32
    %c0_i32_1 = arith.constant 0 : i32
    return %c0_i32, %c0_i32_0 : i32, i32
  }
  func.func @transform_5(%arg0: i32, %arg1: i32) -> (i32, i32) {
    %c0_i32 = arith.constant 0 : i32
    %c0_i32_0 = arith.constant 0 : i32
    %c0_i32_1 = arith.constant 0 : i32
    return %c0_i32, %c0_i32_0 : i32, i32
  }
  func.func @transform_6(%arg0: i32, %arg1: i32) -> (i32, i32) {
    %c0_i32 = arith.constant 0 : i32
    %c0_i32_0 = arith.constant 0 : i32
    %c0_i32_1 = arith.constant 0 : i32
    return %c0_i32, %c0_i32_0 : i32, i32
  }
  func.func @transform_7(%arg0: i32, %arg1: i32) -> (i32, i32) {
    %c0_i32 = arith.constant 0 : i32
    %c0_i32_0 = arith.constant 0 : i32
    %c0_i32_1 = arith.constant 0 : i32
    return %c0_i32, %c0_i32_0 : i32, i32
  }
  func.func @transform_8(%arg0: i32, %arg1: i32) -> (i32, i32) {
    %c0_i32 = arith.constant 0 : i32
    %c0_i32_0 = arith.constant 0 : i32
    return %arg0, %c0_i32 : i32, i32
  }
}

module attributes {stable_mosaic.version = 11 : i64} {
  func.func @kernel(%arg0: i32, %arg1: i32, %arg2: memref<24x24xbf16, #tpu.memory_space<vmem>>, %arg3: memref<24x24xbf16, #tpu.memory_space<vmem>>, %arg4: memref<24x24xbf16, #tpu.memory_space<vmem>>, %arg5: memref<24x96xbf16, #tpu.memory_space<vmem>>, %arg6: memref<1x96xf32, #tpu.memory_space<vmem>>, %arg7: memref<3x32x32xbf16, #tpu.memory_space<vmem>>, %arg8: memref<24x96xbf16, #tpu.memory_space<vmem>>, %arg9: memref<24x96xf32, #tpu.memory_space<vmem>>) attributes {dimension_semantics = [#tpu.dimension_semantics<parallel>, #tpu.dimension_semantics<arbitrary>], iteration_bounds = array<i64: 1, 1>, scalar_prefetch = 0 : i64, scratch_operands = 1 : i64, tpu.core_type = #tpu.core_type<tc>, window_params = [{transform_indices = @transform_0, window_bounds = array<i64: 24, 24>}, {transform_indices = @transform_1, window_bounds = array<i64: 24, 24>}, {transform_indices = @transform_2, window_bounds = array<i64: 24, 24>}, {transform_indices = @transform_3, window_bounds = array<i64: 24, 96>}, {pipeline_mode = #tpu.pipeline_mode<synchronous>, transform_indices = @transform_4, window_bounds = array<i64: 1, 96>}, {pipeline_mode = #tpu.pipeline_mode<synchronous>, transform_indices = @transform_5, window_bounds = array<i64: 3, 32, 32>}, {transform_indices = @transform_6, window_bounds = array<i64: 24, 96>}]} {
    %c0_i32 = arith.constant 0 : i32
    %0 = arith.cmpi eq, %arg1, %c0_i32 : i32
    %1 = arith.extui %0 : i1 to i32
    %c0_i32_0 = arith.constant 0 : i32
    %2 = arith.cmpi ne, %1, %c0_i32_0 : i32
    scf.if %2 {
      %cst_22 = arith.constant 0.000000e+00 : f32
      %25 = vector.broadcast %cst_22 : f32 to vector<24x96xf32>
      %c0_23 = arith.constant 0 : index
      %c0_24 = arith.constant 0 : index
      %26 = vector.load %arg9[%c0_23, %c0_24] : memref<24x96xf32, #tpu.memory_space<vmem>>, vector<24x96xf32>
      tpu.vector_store %arg9[%c0_23, %c0_24], %25 {strides = array<i32>} : memref<24x96xf32, #tpu.memory_space<vmem>>, vector<24x96xf32>,
    } else {
    }
    %c0 = arith.constant 0 : index
    %c0_1 = arith.constant 0 : index
    %3 = vector.load %arg5[%c0, %c0_1] : memref<24x96xbf16, #tpu.memory_space<vmem>>, vector<24x96xbf16>
    %c0_2 = arith.constant 0 : index
    %c0_3 = arith.constant 0 : index
    %4 = vector.load %arg9[%c0_2, %c0_3] : memref<24x96xf32, #tpu.memory_space<vmem>>, vector<24x32xf32>
    %c0_4 = arith.constant 0 : index
    %c0_5 = arith.constant 0 : index
    %5 = vector.load %arg2[%c0_4, %c0_5] : memref<24x24xbf16, #tpu.memory_space<vmem>>, vector<24x24xbf16>
    %6 = vector.extract_strided_slice %3 {offsets = [0, 0], sizes = [24, 32], strides = [1, 1]} : vector<24x96xbf16> to vector<24x32xbf16>
    %cst = arith.constant dense<0.000000e+00> : vector<24x32xf32>
    %7 = tpu.matmul %5, %6, %cst {dimension_numbers = #tpu.dot_dimension_numbers<[1], [0], [0], [1], [0, 0, 1, 1], [], []>} : vector<24x24xbf16>, vector<24x32xbf16>, vector<24x32xf32> -> vector<24x32xf32>
    %8 = arith.addf %4, %7 : vector<24x32xf32>
    %c0_6 = arith.constant 0 : index
    %c0_7 = arith.constant 0 : index
    %9 = vector.load %arg9[%c0_6, %c0_7] : memref<24x96xf32, #tpu.memory_space<vmem>>, vector<24x32xf32>
    tpu.vector_store %arg9[%c0_6, %c0_7], %8 {strides = array<i32>} : memref<24x96xf32, #tpu.memory_space<vmem>>, vector<24x32xf32>,
    %c0_8 = arith.constant 0 : index
    %c32 = arith.constant 32 : index
    %10 = vector.load %arg9[%c0_8, %c32] : memref<24x96xf32, #tpu.memory_space<vmem>>, vector<24x32xf32>
    %c0_9 = arith.constant 0 : index
    %c0_10 = arith.constant 0 : index
    %11 = vector.load %arg3[%c0_9, %c0_10] : memref<24x24xbf16, #tpu.memory_space<vmem>>, vector<24x24xbf16>
    %12 = vector.extract_strided_slice %3 {offsets = [0, 32], sizes = [24, 32], strides = [1, 1]} : vector<24x96xbf16> to vector<24x32xbf16>
    %cst_11 = arith.constant dense<0.000000e+00> : vector<24x32xf32>
    %13 = tpu.matmul %11, %12, %cst_11 {dimension_numbers = #tpu.dot_dimension_numbers<[1], [0], [0], [1], [0, 0, 1, 1], [], []>} : vector<24x24xbf16>, vector<24x32xbf16>, vector<24x32xf32> -> vector<24x32xf32>
    %14 = arith.addf %10, %13 : vector<24x32xf32>
    %c0_12 = arith.constant 0 : index
    %c32_13 = arith.constant 32 : index
    %15 = vector.load %arg9[%c0_12, %c32_13] : memref<24x96xf32, #tpu.memory_space<vmem>>, vector<24x32xf32>
    tpu.vector_store %arg9[%c0_12, %c32_13], %14 {strides = array<i32>} : memref<24x96xf32, #tpu.memory_space<vmem>>, vector<24x32xf32>,
    %c0_14 = arith.constant 0 : index
    %c64 = arith.constant 64 : index
    %16 = vector.load %arg9[%c0_14, %c64] : memref<24x96xf32, #tpu.memory_space<vmem>>, vector<24x32xf32>
    %c0_15 = arith.constant 0 : index
    %c0_16 = arith.constant 0 : index
    %17 = vector.load %arg4[%c0_15, %c0_16] : memref<24x24xbf16, #tpu.memory_space<vmem>>, vector<24x24xbf16>
    %18 = vector.extract_strided_slice %3 {offsets = [0, 64], sizes = [24, 32], strides = [1, 1]} : vector<24x96xbf16> to vector<24x32xbf16>
    %cst_17 = arith.constant dense<0.000000e+00> : vector<24x32xf32>
    %19 = tpu.matmul %17, %18, %cst_17 {dimension_numbers = #tpu.dot_dimension_numbers<[1], [0], [0], [1], [0, 0, 1, 1], [], []>} : vector<24x24xbf16>, vector<24x32xbf16>, vector<24x32xf32> -> vector<24x32xf32>
    %20 = arith.addf %16, %19 : vector<24x32xf32>
    %c0_18 = arith.constant 0 : index
    %c64_19 = arith.constant 64 : index
    %21 = vector.load %arg9[%c0_18, %c64_19] : memref<24x96xf32, #tpu.memory_space<vmem>>, vector<24x32xf32>
    tpu.vector_store %arg9[%c0_18, %c64_19], %20 {strides = array<i32>} : memref<24x96xf32, #tpu.memory_space<vmem>>, vector<24x32xf32>,
    %c0_i32_20 = arith.constant 0 : i32
    %22 = arith.cmpi eq, %arg1, %c0_i32_20 : i32
    %23 = arith.extui %22 : i1 to i32
    %c0_i32_21 = arith.constant 0 : i32
    %24 = arith.cmpi ne, %23, %c0_i32_21 : i32
    scf.if %24 {
      %c0_22 = arith.constant 0 : index
      %c0_23 = arith.constant 0 : index
      %25 = vector.load %arg9[%c0_22, %c0_23] : memref<24x96xf32, #tpu.memory_space<vmem>>, vector<24x96xf32>
      %c0_24 = arith.constant 0 : index
      %c0_25 = arith.constant 0 : index
      %26 = vector.load %arg6[%c0_24, %c0_25] : memref<1x96xf32, #tpu.memory_space<vmem>>, vector<1x96xf32>
      %27 = vector.broadcast %26 : vector<1x96xf32> to vector<24x96xf32>
      %28 = arith.addf %25, %27 : vector<24x96xf32>
      %cst_26 = arith.constant 0.000000e+00 : f32
      %29 = vector.broadcast %cst_26 : f32 to vector<24x96xf32>
      %30 = arith.maximumf %28, %29 : vector<24x96xf32>
      %31 = vector.extract_strided_slice %30 {offsets = [0, 0], sizes = [24, 32], strides = [1, 1]} : vector<24x96xf32> to vector<24x32xf32>
      %32 = arith.truncf %31 : vector<24x32xf32> to vector<24x32xbf16>
      %c0_27 = arith.constant 0 : index
      %c0_28 = arith.constant 0 : index
      %c0_29 = arith.constant 0 : index
      %33 = vector.load %arg7[%c0_27, %c0_28, %c0_29] : memref<3x32x32xbf16, #tpu.memory_space<vmem>>, vector<1x32x32xbf16>
      %34 = vector.shape_cast %33 : vector<1x32x32xbf16> to vector<32x32xbf16>
      %cst_30 = arith.constant dense<0.000000e+00> : vector<24x32xf32>
      %35 = tpu.matmul %32, %34, %cst_30 {dimension_numbers = #tpu.dot_dimension_numbers<[1], [0], [0], [1], [0, 0, 1, 1], [], []>} : vector<24x32xbf16>, vector<32x32xbf16>, vector<24x32xf32> -> vector<24x32xf32>
      %36 = arith.truncf %35 : vector<24x32xf32> to vector<24x32xbf16>
      %c0_31 = arith.constant 0 : index
      %c0_32 = arith.constant 0 : index
      %37 = vector.load %arg8[%c0_31, %c0_32] : memref<24x96xbf16, #tpu.memory_space<vmem>>, vector<24x32xbf16>
      tpu.vector_store %arg8[%c0_31, %c0_32], %36 {strides = array<i32>} : memref<24x96xbf16, #tpu.memory_space<vmem>>, vector<24x32xbf16>,
      %38 = vector.extract_strided_slice %30 {offsets = [0, 32], sizes = [24, 32], strides = [1, 1]} : vector<24x96xf32> to vector<24x32xf32>
      %39 = arith.truncf %38 : vector<24x32xf32> to vector<24x32xbf16>
      %c1 = arith.constant 1 : index
      %c0_33 = arith.constant 0 : index
      %c0_34 = arith.constant 0 : index
      %40 = vector.load %arg7[%c1, %c0_33, %c0_34] : memref<3x32x32xbf16, #tpu.memory_space<vmem>>, vector<1x32x32xbf16>
      %41 = vector.shape_cast %40 : vector<1x32x32xbf16> to vector<32x32xbf16>
      %cst_35 = arith.constant dense<0.000000e+00> : vector<24x32xf32>
      %42 = tpu.matmul %39, %41, %cst_35 {dimension_numbers = #tpu.dot_dimension_numbers<[1], [0], [0], [1], [0, 0, 1, 1], [], []>} : vector<24x32xbf16>, vector<32x32xbf16>, vector<24x32xf32> -> vector<24x32xf32>
      %43 = arith.truncf %42 : vector<24x32xf32> to vector<24x32xbf16>
      %c0_36 = arith.constant 0 : index
      %c32_37 = arith.constant 32 : index
      %44 = vector.load %arg8[%c0_36, %c32_37] : memref<24x96xbf16, #tpu.memory_space<vmem>>, vector<24x32xbf16>
      tpu.vector_store %arg8[%c0_36, %c32_37], %43 {strides = array<i32>} : memref<24x96xbf16, #tpu.memory_space<vmem>>, vector<24x32xbf16>,
      %45 = vector.extract_strided_slice %30 {offsets = [0, 64], sizes = [24, 32], strides = [1, 1]} : vector<24x96xf32> to vector<24x32xf32>
      %46 = arith.truncf %45 : vector<24x32xf32> to vector<24x32xbf16>
      %c2 = arith.constant 2 : index
      %c0_38 = arith.constant 0 : index
      %c0_39 = arith.constant 0 : index
      %47 = vector.load %arg7[%c2, %c0_38, %c0_39] : memref<3x32x32xbf16, #tpu.memory_space<vmem>>, vector<1x32x32xbf16>
      %48 = vector.shape_cast %47 : vector<1x32x32xbf16> to vector<32x32xbf16>
      %cst_40 = arith.constant dense<0.000000e+00> : vector<24x32xf32>
      %49 = tpu.matmul %46, %48, %cst_40 {dimension_numbers = #tpu.dot_dimension_numbers<[1], [0], [0], [1], [0, 0, 1, 1], [], []>} : vector<24x32xbf16>, vector<32x32xbf16>, vector<24x32xf32> -> vector<24x32xf32>
      %50 = arith.truncf %49 : vector<24x32xf32> to vector<24x32xbf16>
      %c0_41 = arith.constant 0 : index
      %c64_42 = arith.constant 64 : index
      %51 = vector.load %arg8[%c0_41, %c64_42] : memref<24x96xbf16, #tpu.memory_space<vmem>>, vector<24x32xbf16>
      tpu.vector_store %arg8[%c0_41, %c64_42], %50 {strides = array<i32>} : memref<24x96xbf16, #tpu.memory_space<vmem>>, vector<24x32xbf16>,
    } else {
    }
    return
  }
  func.func @transform_0(%arg0: i32, %arg1: i32) -> (i32, i32) {
    %c0_i32 = arith.constant 0 : i32
    return %arg0, %arg1 : i32, i32
  }
  func.func @transform_1(%arg0: i32, %arg1: i32) -> (i32, i32) {
    %c0_i32 = arith.constant 0 : i32
    return %arg0, %arg1 : i32, i32
  }
  func.func @transform_2(%arg0: i32, %arg1: i32) -> (i32, i32) {
    %c0_i32 = arith.constant 0 : i32
    return %arg0, %arg1 : i32, i32
  }
  func.func @transform_3(%arg0: i32, %arg1: i32) -> (i32, i32) {
    %c0_i32 = arith.constant 0 : i32
    %c0_i32_0 = arith.constant 0 : i32
    return %arg1, %c0_i32 : i32, i32
  }
  func.func @transform_4(%arg0: i32, %arg1: i32) -> (i32, i32) {
    %c0_i32 = arith.constant 0 : i32
    %c0_i32_0 = arith.constant 0 : i32
    %c0_i32_1 = arith.constant 0 : i32
    return %c0_i32, %c0_i32_0 : i32, i32
  }
  func.func @transform_5(%arg0: i32, %arg1: i32) -> (i32, i32, i32) {
    %c0_i32 = arith.constant 0 : i32
    %c0_i32_0 = arith.constant 0 : i32
    %c0_i32_1 = arith.constant 0 : i32
    %c0_i32_2 = arith.constant 0 : i32
    return %c0_i32, %c0_i32_0, %c0_i32_1 : i32, i32, i32
  }
  func.func @transform_6(%arg0: i32, %arg1: i32) -> (i32, i32) {
    %c0_i32 = arith.constant 0 : i32
    %c0_i32_0 = arith.constant 0 : i32
    return %arg0, %c0_i32 : i32, i32
  }
}

module attributes {stable_mosaic.version = 11 : i64} {
  func.func @proj_kernel(%arg0: i32, %arg1: memref<16x32xbf16, #tpu.memory_space<vmem>>, %arg2: memref<32x64xbf16, #tpu.memory_space<vmem>>, %arg3: memref<16x64xbf16, #tpu.memory_space<vmem>>) attributes {dimension_semantics = [#tpu.dimension_semantics<parallel>], iteration_bounds = array<i64: 1>, scalar_prefetch = 0 : i64, scratch_operands = 0 : i64, tpu.core_type = #tpu.core_type<tc>, window_params = [{transform_indices = @transform_0, window_bounds = array<i64: 16, 32>}, {pipeline_mode = #tpu.pipeline_mode<synchronous>, transform_indices = @transform_1, window_bounds = array<i64: 32, 64>}, {transform_indices = @transform_2, window_bounds = array<i64: 16, 64>}]} {
    %c0 = arith.constant 0 : index
    %c0_0 = arith.constant 0 : index
    %0 = vector.load %arg1[%c0, %c0_0] : memref<16x32xbf16, #tpu.memory_space<vmem>>, vector<16x32xbf16>
    %c0_1 = arith.constant 0 : index
    %c0_2 = arith.constant 0 : index
    %1 = vector.load %arg2[%c0_1, %c0_2] : memref<32x64xbf16, #tpu.memory_space<vmem>>, vector<32x64xbf16>
    %cst = arith.constant dense<0.000000e+00> : vector<16x64xf32>
    %2 = tpu.matmul %0, %1, %cst {dimension_numbers = #tpu.dot_dimension_numbers<[1], [0], [0], [1], [0, 0, 1, 1], [], []>} : vector<16x32xbf16>, vector<32x64xbf16>, vector<16x64xf32> -> vector<16x64xf32>
    %3 = arith.truncf %2 : vector<16x64xf32> to vector<16x64xbf16>
    %c0_3 = arith.constant 0 : index
    %c0_4 = arith.constant 0 : index
    %4 = vector.load %arg3[%c0_3, %c0_4] : memref<16x64xbf16, #tpu.memory_space<vmem>>, vector<16x64xbf16>
    tpu.vector_store %arg3[%c0_3, %c0_4], %3 {strides = array<i32>} : memref<16x64xbf16, #tpu.memory_space<vmem>>, vector<16x64xbf16>,
    return
  }
  func.func @transform_0(%arg0: i32) -> (i32, i32) {
    %c0_i32 = arith.constant 0 : i32
    %c0_i32_0 = arith.constant 0 : i32
    return %arg0, %c0_i32 : i32, i32
  }
  func.func @transform_1(%arg0: i32) -> (i32, i32) {
    %c0_i32 = arith.constant 0 : i32
    %c0_i32_0 = arith.constant 0 : i32
    %c0_i32_1 = arith.constant 0 : i32
    return %c0_i32, %c0_i32_0 : i32, i32
  }
  func.func @transform_2(%arg0: i32) -> (i32, i32) {
    %c0_i32 = arith.constant 0 : i32
    %c0_i32_0 = arith.constant 0 : i32
    return %arg0, %c0_i32 : i32, i32
  }
}

module attributes {stable_mosaic.version = 11 : i64} {
  func.func @proj_kernel(%arg0: i32, %arg1: memref<24x32xbf16, #tpu.memory_space<vmem>>, %arg2: memref<32x96xbf16, #tpu.memory_space<vmem>>, %arg3: memref<24x96xbf16, #tpu.memory_space<vmem>>) attributes {dimension_semantics = [#tpu.dimension_semantics<parallel>], iteration_bounds = array<i64: 1>, scalar_prefetch = 0 : i64, scratch_operands = 0 : i64, tpu.core_type = #tpu.core_type<tc>, window_params = [{transform_indices = @transform_0, window_bounds = array<i64: 24, 32>}, {pipeline_mode = #tpu.pipeline_mode<synchronous>, transform_indices = @transform_1, window_bounds = array<i64: 32, 96>}, {transform_indices = @transform_2, window_bounds = array<i64: 24, 96>}]} {
    %c0 = arith.constant 0 : index
    %c0_0 = arith.constant 0 : index
    %0 = vector.load %arg1[%c0, %c0_0] : memref<24x32xbf16, #tpu.memory_space<vmem>>, vector<24x32xbf16>
    %c0_1 = arith.constant 0 : index
    %c0_2 = arith.constant 0 : index
    %1 = vector.load %arg2[%c0_1, %c0_2] : memref<32x96xbf16, #tpu.memory_space<vmem>>, vector<32x96xbf16>
    %cst = arith.constant dense<0.000000e+00> : vector<24x96xf32>
    %2 = tpu.matmul %0, %1, %cst {dimension_numbers = #tpu.dot_dimension_numbers<[1], [0], [0], [1], [0, 0, 1, 1], [], []>} : vector<24x32xbf16>, vector<32x96xbf16>, vector<24x96xf32> -> vector<24x96xf32>
    %3 = arith.truncf %2 : vector<24x96xf32> to vector<24x96xbf16>
    %c0_3 = arith.constant 0 : index
    %c0_4 = arith.constant 0 : index
    %4 = vector.load %arg3[%c0_3, %c0_4] : memref<24x96xbf16, #tpu.memory_space<vmem>>, vector<24x96xbf16>
    tpu.vector_store %arg3[%c0_3, %c0_4], %3 {strides = array<i32>} : memref<24x96xbf16, #tpu.memory_space<vmem>>, vector<24x96xbf16>,
    return
  }
  func.func @transform_0(%arg0: i32) -> (i32, i32) {
    %c0_i32 = arith.constant 0 : i32
    %c0_i32_0 = arith.constant 0 : i32
    return %arg0, %c0_i32 : i32, i32
  }
  func.func @transform_1(%arg0: i32) -> (i32, i32) {
    %c0_i32 = arith.constant 0 : i32
    %c0_i32_0 = arith.constant 0 : i32
    %c0_i32_1 = arith.constant 0 : i32
    return %c0_i32, %c0_i32_0 : i32, i32
  }
  func.func @transform_2(%arg0: i32) -> (i32, i32) {
    %c0_i32 = arith.constant 0 : i32
    %c0_i32_0 = arith.constant 0 : i32
    return %arg0, %c0_i32 : i32, i32
  }
}

module attributes {stable_mosaic.version = 11 : i64} {
  func.func @kernel(%arg0: i32, %arg1: i32, %arg2: memref<16x16xbf16, #tpu.memory_space<vmem>>, %arg3: memref<16x16xbf16, #tpu.memory_space<vmem>>, %arg4: memref<16x64xbf16, #tpu.memory_space<vmem>>, %arg5: memref<1x64xf32, #tpu.memory_space<vmem>>, %arg6: memref<2x32x32xbf16, #tpu.memory_space<vmem>>, %arg7: memref<16x64xbf16, #tpu.memory_space<vmem>>, %arg8: memref<16x64xf32, #tpu.memory_space<vmem>>) attributes {dimension_semantics = [#tpu.dimension_semantics<parallel>, #tpu.dimension_semantics<arbitrary>], iteration_bounds = array<i64: 1, 1>, scalar_prefetch = 0 : i64, scratch_operands = 1 : i64, tpu.core_type = #tpu.core_type<tc>, window_params = [{transform_indices = @transform_0, window_bounds = array<i64: 16, 16>}, {transform_indices = @transform_1, window_bounds = array<i64: 16, 16>}, {transform_indices = @transform_2, window_bounds = array<i64: 16, 64>}, {pipeline_mode = #tpu.pipeline_mode<synchronous>, transform_indices = @transform_3, window_bounds = array<i64: 1, 64>}, {pipeline_mode = #tpu.pipeline_mode<synchronous>, transform_indices = @transform_4, window_bounds = array<i64: 2, 32, 32>}, {transform_indices = @transform_5, window_bounds = array<i64: 16, 64>}]} {
    %c0_i32 = arith.constant 0 : i32
    %0 = arith.cmpi eq, %arg1, %c0_i32 : i32
    %1 = arith.extui %0 : i1 to i32
    %c0_i32_0 = arith.constant 0 : i32
    %2 = arith.cmpi ne, %1, %c0_i32_0 : i32
    scf.if %2 {
      %cst_16 = arith.constant 0.000000e+00 : f32
      %19 = vector.broadcast %cst_16 : f32 to vector<16x64xf32>
      %c0_17 = arith.constant 0 : index
      %c0_18 = arith.constant 0 : index
      %20 = vector.load %arg8[%c0_17, %c0_18] : memref<16x64xf32, #tpu.memory_space<vmem>>, vector<16x64xf32>
      tpu.vector_store %arg8[%c0_17, %c0_18], %19 {strides = array<i32>} : memref<16x64xf32, #tpu.memory_space<vmem>>, vector<16x64xf32>,
    } else {
    }
    %c0 = arith.constant 0 : index
    %c0_1 = arith.constant 0 : index
    %3 = vector.load %arg4[%c0, %c0_1] : memref<16x64xbf16, #tpu.memory_space<vmem>>, vector<16x64xbf16>
    %c0_2 = arith.constant 0 : index
    %c0_3 = arith.constant 0 : index
    %4 = vector.load %arg8[%c0_2, %c0_3] : memref<16x64xf32, #tpu.memory_space<vmem>>, vector<16x32xf32>
    %c0_4 = arith.constant 0 : index
    %c0_5 = arith.constant 0 : index
    %5 = vector.load %arg2[%c0_4, %c0_5] : memref<16x16xbf16, #tpu.memory_space<vmem>>, vector<16x16xbf16>
    %6 = vector.extract_strided_slice %3 {offsets = [0, 0], sizes = [16, 32], strides = [1, 1]} : vector<16x64xbf16> to vector<16x32xbf16>
    %cst = arith.constant dense<0.000000e+00> : vector<16x32xf32>
    %7 = tpu.matmul %5, %6, %cst {dimension_numbers = #tpu.dot_dimension_numbers<[1], [0], [0], [1], [0, 0, 1, 1], [], []>} : vector<16x16xbf16>, vector<16x32xbf16>, vector<16x32xf32> -> vector<16x32xf32>
    %8 = arith.addf %4, %7 : vector<16x32xf32>
    %c0_6 = arith.constant 0 : index
    %c0_7 = arith.constant 0 : index
    %9 = vector.load %arg8[%c0_6, %c0_7] : memref<16x64xf32, #tpu.memory_space<vmem>>, vector<16x32xf32>
    tpu.vector_store %arg8[%c0_6, %c0_7], %8 {strides = array<i32>} : memref<16x64xf32, #tpu.memory_space<vmem>>, vector<16x32xf32>,
    %c0_8 = arith.constant 0 : index
    %c32 = arith.constant 32 : index
    %10 = vector.load %arg8[%c0_8, %c32] : memref<16x64xf32, #tpu.memory_space<vmem>>, vector<16x32xf32>
    %c0_9 = arith.constant 0 : index
    %c0_10 = arith.constant 0 : index
    %11 = vector.load %arg3[%c0_9, %c0_10] : memref<16x16xbf16, #tpu.memory_space<vmem>>, vector<16x16xbf16>
    %12 = vector.extract_strided_slice %3 {offsets = [0, 32], sizes = [16, 32], strides = [1, 1]} : vector<16x64xbf16> to vector<16x32xbf16>
    %cst_11 = arith.constant dense<0.000000e+00> : vector<16x32xf32>
    %13 = tpu.matmul %11, %12, %cst_11 {dimension_numbers = #tpu.dot_dimension_numbers<[1], [0], [0], [1], [0, 0, 1, 1], [], []>} : vector<16x16xbf16>, vector<16x32xbf16>, vector<16x32xf32> -> vector<16x32xf32>
    %14 = arith.addf %10, %13 : vector<16x32xf32>
    %c0_12 = arith.constant 0 : index
    %c32_13 = arith.constant 32 : index
    %15 = vector.load %arg8[%c0_12, %c32_13] : memref<16x64xf32, #tpu.memory_space<vmem>>, vector<16x32xf32>
    tpu.vector_store %arg8[%c0_12, %c32_13], %14 {strides = array<i32>} : memref<16x64xf32, #tpu.memory_space<vmem>>, vector<16x32xf32>,
    %c0_i32_14 = arith.constant 0 : i32
    %16 = arith.cmpi eq, %arg1, %c0_i32_14 : i32
    %17 = arith.extui %16 : i1 to i32
    %c0_i32_15 = arith.constant 0 : i32
    %18 = arith.cmpi ne, %17, %c0_i32_15 : i32
    scf.if %18 {
      %c0_16 = arith.constant 0 : index
      %c0_17 = arith.constant 0 : index
      %19 = vector.load %arg8[%c0_16, %c0_17] : memref<16x64xf32, #tpu.memory_space<vmem>>, vector<16x64xf32>
      %c0_18 = arith.constant 0 : index
      %c0_19 = arith.constant 0 : index
      %20 = vector.load %arg5[%c0_18, %c0_19] : memref<1x64xf32, #tpu.memory_space<vmem>>, vector<1x64xf32>
      %21 = vector.broadcast %20 : vector<1x64xf32> to vector<16x64xf32>
      %22 = arith.addf %19, %21 : vector<16x64xf32>
      %cst_20 = arith.constant 0.000000e+00 : f32
      %23 = vector.broadcast %cst_20 : f32 to vector<16x64xf32>
      %24 = arith.maximumf %22, %23 : vector<16x64xf32>
      %25 = vector.extract_strided_slice %24 {offsets = [0, 0], sizes = [16, 32], strides = [1, 1]} : vector<16x64xf32> to vector<16x32xf32>
      %26 = arith.truncf %25 : vector<16x32xf32> to vector<16x32xbf16>
      %c0_21 = arith.constant 0 : index
      %c0_22 = arith.constant 0 : index
      %c0_23 = arith.constant 0 : index
      %27 = vector.load %arg6[%c0_21, %c0_22, %c0_23] : memref<2x32x32xbf16, #tpu.memory_space<vmem>>, vector<1x32x32xbf16>
      %28 = vector.shape_cast %27 : vector<1x32x32xbf16> to vector<32x32xbf16>
      %cst_24 = arith.constant dense<0.000000e+00> : vector<16x32xf32>
      %29 = tpu.matmul %26, %28, %cst_24 {dimension_numbers = #tpu.dot_dimension_numbers<[1], [0], [0], [1], [0, 0, 1, 1], [], []>} : vector<16x32xbf16>, vector<32x32xbf16>, vector<16x32xf32> -> vector<16x32xf32>
      %30 = arith.truncf %29 : vector<16x32xf32> to vector<16x32xbf16>
      %c0_25 = arith.constant 0 : index
      %c0_26 = arith.constant 0 : index
      %31 = vector.load %arg7[%c0_25, %c0_26] : memref<16x64xbf16, #tpu.memory_space<vmem>>, vector<16x32xbf16>
      tpu.vector_store %arg7[%c0_25, %c0_26], %30 {strides = array<i32>} : memref<16x64xbf16, #tpu.memory_space<vmem>>, vector<16x32xbf16>,
      %32 = vector.extract_strided_slice %24 {offsets = [0, 32], sizes = [16, 32], strides = [1, 1]} : vector<16x64xf32> to vector<16x32xf32>
      %33 = arith.truncf %32 : vector<16x32xf32> to vector<16x32xbf16>
      %c1 = arith.constant 1 : index
      %c0_27 = arith.constant 0 : index
      %c0_28 = arith.constant 0 : index
      %34 = vector.load %arg6[%c1, %c0_27, %c0_28] : memref<2x32x32xbf16, #tpu.memory_space<vmem>>, vector<1x32x32xbf16>
      %35 = vector.shape_cast %34 : vector<1x32x32xbf16> to vector<32x32xbf16>
      %cst_29 = arith.constant dense<0.000000e+00> : vector<16x32xf32>
      %36 = tpu.matmul %33, %35, %cst_29 {dimension_numbers = #tpu.dot_dimension_numbers<[1], [0], [0], [1], [0, 0, 1, 1], [], []>} : vector<16x32xbf16>, vector<32x32xbf16>, vector<16x32xf32> -> vector<16x32xf32>
      %37 = arith.truncf %36 : vector<16x32xf32> to vector<16x32xbf16>
      %c0_30 = arith.constant 0 : index
      %c32_31 = arith.constant 32 : index
      %38 = vector.load %arg7[%c0_30, %c32_31] : memref<16x64xbf16, #tpu.memory_space<vmem>>, vector<16x32xbf16>
      tpu.vector_store %arg7[%c0_30, %c32_31], %37 {strides = array<i32>} : memref<16x64xbf16, #tpu.memory_space<vmem>>, vector<16x32xbf16>,
    } else {
    }
    return
  }
  func.func @transform_0(%arg0: i32, %arg1: i32) -> (i32, i32) {
    %c0_i32 = arith.constant 0 : i32
    return %arg0, %arg1 : i32, i32
  }
  func.func @transform_1(%arg0: i32, %arg1: i32) -> (i32, i32) {
    %c0_i32 = arith.constant 0 : i32
    return %arg0, %arg1 : i32, i32
  }
  func.func @transform_2(%arg0: i32, %arg1: i32) -> (i32, i32) {
    %c0_i32 = arith.constant 0 : i32
    %c0_i32_0 = arith.constant 0 : i32
    return %arg1, %c0_i32 : i32, i32
  }
  func.func @transform_3(%arg0: i32, %arg1: i32) -> (i32, i32) {
    %c0_i32 = arith.constant 0 : i32
    %c0_i32_0 = arith.constant 0 : i32
    %c0_i32_1 = arith.constant 0 : i32
    return %c0_i32, %c0_i32_0 : i32, i32
  }
  func.func @transform_4(%arg0: i32, %arg1: i32) -> (i32, i32, i32) {
    %c0_i32 = arith.constant 0 : i32
    %c0_i32_0 = arith.constant 0 : i32
    %c0_i32_1 = arith.constant 0 : i32
    %c0_i32_2 = arith.constant 0 : i32
    return %c0_i32, %c0_i32_0, %c0_i32_1 : i32, i32, i32
  }
  func.func @transform_5(%arg0: i32, %arg1: i32) -> (i32, i32) {
    %c0_i32 = arith.constant 0 : i32
    %c0_i32_0 = arith.constant 0 : i32
    return %arg0, %c0_i32 : i32, i32
  }
}

module attributes {stable_mosaic.version = 11 : i64} {
  func.func @kernel(%arg0: i32, %arg1: i32, %arg2: memref<16x16xbf16, #tpu.memory_space<vmem>>, %arg3: memref<16x16xbf16, #tpu.memory_space<vmem>>, %arg4: memref<16x64xbf16, #tpu.memory_space<vmem>>, %arg5: memref<1x64xf32, #tpu.memory_space<vmem>>, %arg6: memref<32x128xbf16, #tpu.memory_space<vmem>>, %arg7: memref<1x128xf32, #tpu.memory_space<vmem>>, %arg8: memref<1x128xf32, #tpu.memory_space<vmem>>, %arg9: memref<16x32xbf16, #tpu.memory_space<vmem>>, %arg10: memref<16x64xf32, #tpu.memory_space<vmem>>) attributes {dimension_semantics = [#tpu.dimension_semantics<parallel>, #tpu.dimension_semantics<arbitrary>], iteration_bounds = array<i64: 1, 1>, scalar_prefetch = 0 : i64, scratch_operands = 1 : i64, tpu.core_type = #tpu.core_type<tc>, window_params = [{transform_indices = @transform_0, window_bounds = array<i64: 16, 16>}, {transform_indices = @transform_1, window_bounds = array<i64: 16, 16>}, {transform_indices = @transform_2, window_bounds = array<i64: 16, 64>}, {pipeline_mode = #tpu.pipeline_mode<synchronous>, transform_indices = @transform_3, window_bounds = array<i64: 1, 64>}, {pipeline_mode = #tpu.pipeline_mode<synchronous>, transform_indices = @transform_4, window_bounds = array<i64: 32, 128>}, {pipeline_mode = #tpu.pipeline_mode<synchronous>, transform_indices = @transform_5, window_bounds = array<i64: 1, 128>}, {pipeline_mode = #tpu.pipeline_mode<synchronous>, transform_indices = @transform_6, window_bounds = array<i64: 1, 128>}, {transform_indices = @transform_7, window_bounds = array<i64: 16, 32>}]} {
    %c0_i32 = arith.constant 0 : i32
    %0 = arith.cmpi eq, %arg1, %c0_i32 : i32
    %1 = arith.extui %0 : i1 to i32
    %c0_i32_0 = arith.constant 0 : i32
    %2 = arith.cmpi ne, %1, %c0_i32_0 : i32
    scf.if %2 {
      %cst_16 = arith.constant 0.000000e+00 : f32
      %19 = vector.broadcast %cst_16 : f32 to vector<16x64xf32>
      %c0_17 = arith.constant 0 : index
      %c0_18 = arith.constant 0 : index
      %20 = vector.load %arg10[%c0_17, %c0_18] : memref<16x64xf32, #tpu.memory_space<vmem>>, vector<16x64xf32>
      tpu.vector_store %arg10[%c0_17, %c0_18], %19 {strides = array<i32>} : memref<16x64xf32, #tpu.memory_space<vmem>>, vector<16x64xf32>,
    } else {
    }
    %c0 = arith.constant 0 : index
    %c0_1 = arith.constant 0 : index
    %3 = vector.load %arg4[%c0, %c0_1] : memref<16x64xbf16, #tpu.memory_space<vmem>>, vector<16x64xbf16>
    %c0_2 = arith.constant 0 : index
    %c0_3 = arith.constant 0 : index
    %4 = vector.load %arg10[%c0_2, %c0_3] : memref<16x64xf32, #tpu.memory_space<vmem>>, vector<16x32xf32>
    %c0_4 = arith.constant 0 : index
    %c0_5 = arith.constant 0 : index
    %5 = vector.load %arg2[%c0_4, %c0_5] : memref<16x16xbf16, #tpu.memory_space<vmem>>, vector<16x16xbf16>
    %6 = vector.extract_strided_slice %3 {offsets = [0, 0], sizes = [16, 32], strides = [1, 1]} : vector<16x64xbf16> to vector<16x32xbf16>
    %cst = arith.constant dense<0.000000e+00> : vector<16x32xf32>
    %7 = tpu.matmul %5, %6, %cst {dimension_numbers = #tpu.dot_dimension_numbers<[1], [0], [0], [1], [0, 0, 1, 1], [], []>} : vector<16x16xbf16>, vector<16x32xbf16>, vector<16x32xf32> -> vector<16x32xf32>
    %8 = arith.addf %4, %7 : vector<16x32xf32>
    %c0_6 = arith.constant 0 : index
    %c0_7 = arith.constant 0 : index
    %9 = vector.load %arg10[%c0_6, %c0_7] : memref<16x64xf32, #tpu.memory_space<vmem>>, vector<16x32xf32>
    tpu.vector_store %arg10[%c0_6, %c0_7], %8 {strides = array<i32>} : memref<16x64xf32, #tpu.memory_space<vmem>>, vector<16x32xf32>,
    %c0_8 = arith.constant 0 : index
    %c32 = arith.constant 32 : index
    %10 = vector.load %arg10[%c0_8, %c32] : memref<16x64xf32, #tpu.memory_space<vmem>>, vector<16x32xf32>
    %c0_9 = arith.constant 0 : index
    %c0_10 = arith.constant 0 : index
    %11 = vector.load %arg3[%c0_9, %c0_10] : memref<16x16xbf16, #tpu.memory_space<vmem>>, vector<16x16xbf16>
    %12 = vector.extract_strided_slice %3 {offsets = [0, 32], sizes = [16, 32], strides = [1, 1]} : vector<16x64xbf16> to vector<16x32xbf16>
    %cst_11 = arith.constant dense<0.000000e+00> : vector<16x32xf32>
    %13 = tpu.matmul %11, %12, %cst_11 {dimension_numbers = #tpu.dot_dimension_numbers<[1], [0], [0], [1], [0, 0, 1, 1], [], []>} : vector<16x16xbf16>, vector<16x32xbf16>, vector<16x32xf32> -> vector<16x32xf32>
    %14 = arith.addf %10, %13 : vector<16x32xf32>
    %c0_12 = arith.constant 0 : index
    %c32_13 = arith.constant 32 : index
    %15 = vector.load %arg10[%c0_12, %c32_13] : memref<16x64xf32, #tpu.memory_space<vmem>>, vector<16x32xf32>
    tpu.vector_store %arg10[%c0_12, %c32_13], %14 {strides = array<i32>} : memref<16x64xf32, #tpu.memory_space<vmem>>, vector<16x32xf32>,
    %c0_i32_14 = arith.constant 0 : i32
    %16 = arith.cmpi eq, %arg1, %c0_i32_14 : i32
    %17 = arith.extui %16 : i1 to i32
    %c0_i32_15 = arith.constant 0 : i32
    %18 = arith.cmpi ne, %17, %c0_i32_15 : i32
    scf.if %18 {
      %c0_16 = arith.constant 0 : index
      %c0_17 = arith.constant 0 : index
      %19 = vector.load %arg10[%c0_16, %c0_17] : memref<16x64xf32, #tpu.memory_space<vmem>>, vector<16x64xf32>
      %c0_18 = arith.constant 0 : index
      %c0_19 = arith.constant 0 : index
      %20 = vector.load %arg5[%c0_18, %c0_19] : memref<1x64xf32, #tpu.memory_space<vmem>>, vector<1x64xf32>
      %21 = vector.broadcast %20 : vector<1x64xf32> to vector<16x64xf32>
      %22 = arith.addf %19, %21 : vector<16x64xf32>
      %cst_20 = arith.constant 0.000000e+00 : f32
      %23 = vector.broadcast %cst_20 : f32 to vector<16x64xf32>
      %24 = arith.maximumf %22, %23 : vector<16x64xf32>
      %c0_21 = arith.constant 0 : index
      %c0_22 = arith.constant 0 : index
      %25 = vector.load %arg6[%c0_21, %c0_22] : memref<32x128xbf16, #tpu.memory_space<vmem>>, vector<32x128xbf16>
      %c0_23 = arith.constant 0 : index
      %c0_24 = arith.constant 0 : index
      %26 = vector.load %arg7[%c0_23, %c0_24] : memref<1x128xf32, #tpu.memory_space<vmem>>, vector<1x128xf32>
      %c0_25 = arith.constant 0 : index
      %c0_26 = arith.constant 0 : index
      %27 = vector.load %arg8[%c0_25, %c0_26] : memref<1x128xf32, #tpu.memory_space<vmem>>, vector<1x128xf32>
      %28 = vector.extract_strided_slice %24 {offsets = [0, 0], sizes = [16, 32], strides = [1, 1]} : vector<16x64xf32> to vector<16x32xf32>
      %29 = arith.truncf %28 : vector<16x32xf32> to vector<16x32xbf16>
      %cst_27 = arith.constant dense<0.000000e+00> : vector<16x128xf32>
      %30 = tpu.matmul %29, %25, %cst_27 {dimension_numbers = #tpu.dot_dimension_numbers<[1], [0], [0], [1], [0, 0, 1, 1], [], []>} : vector<16x32xbf16>, vector<32x128xbf16>, vector<16x128xf32> -> vector<16x128xf32>
      %31 = vector.broadcast %26 : vector<1x128xf32> to vector<16x128xf32>
      %32 = arith.addf %30, %31 : vector<16x128xf32>
      %33 = math.tanh %32 : vector<16x128xf32>
      %34 = vector.broadcast %27 : vector<1x128xf32> to vector<16x128xf32>
      %35 = arith.mulf %33, %34 : vector<16x128xf32>
      %cst_28 = arith.constant dense<0.000000e+00> : vector<16xf32>
      %36 = vector.multi_reduction <add>, %35, %cst_28 [1] : vector<16x128xf32> to vector<16xf32>
      %37 = vector.shape_cast %36 : vector<16xf32> to vector<16x1xf32>
      %38 = vector.extract_strided_slice %24 {offsets = [0, 32], sizes = [16, 32], strides = [1, 1]} : vector<16x64xf32> to vector<16x32xf32>
      %39 = arith.truncf %38 : vector<16x32xf32> to vector<16x32xbf16>
      %cst_29 = arith.constant dense<0.000000e+00> : vector<16x128xf32>
      %40 = tpu.matmul %39, %25, %cst_29 {dimension_numbers = #tpu.dot_dimension_numbers<[1], [0], [0], [1], [0, 0, 1, 1], [], []>} : vector<16x32xbf16>, vector<32x128xbf16>, vector<16x128xf32> -> vector<16x128xf32>
      %41 = vector.broadcast %26 : vector<1x128xf32> to vector<16x128xf32>
      %42 = arith.addf %40, %41 : vector<16x128xf32>
      %43 = math.tanh %42 : vector<16x128xf32>
      %44 = vector.broadcast %27 : vector<1x128xf32> to vector<16x128xf32>
      %45 = arith.mulf %43, %44 : vector<16x128xf32>
      %cst_30 = arith.constant dense<0.000000e+00> : vector<16xf32>
      %46 = vector.multi_reduction <add>, %45, %cst_30 [1] : vector<16x128xf32> to vector<16xf32>
      %47 = vector.shape_cast %46 : vector<16xf32> to vector<16x1xf32>
      %48 = arith.maximumf %37, %47 : vector<16x1xf32>
      %49 = arith.subf %37, %48 : vector<16x1xf32>
      %50 = math.exp %49 : vector<16x1xf32>
      %51 = arith.subf %47, %48 : vector<16x1xf32>
      %52 = math.exp %51 : vector<16x1xf32>
      %53 = arith.addf %50, %52 : vector<16x1xf32>
      %54 = tpu.reciprocal %53 {approx = true} : vector<16x1xf32> -> vector<16x1xf32>
      %55 = arith.mulf %50, %54 : vector<16x1xf32>
      %56 = vector.broadcast %55 : vector<16x1xf32> to vector<16x32xf32>
      %57 = arith.mulf %56, %28 : vector<16x32xf32>
      %58 = arith.mulf %52, %54 : vector<16x1xf32>
      %59 = vector.broadcast %58 : vector<16x1xf32> to vector<16x32xf32>
      %60 = arith.mulf %59, %38 : vector<16x32xf32>
      %61 = arith.addf %57, %60 : vector<16x32xf32>
      %62 = arith.truncf %61 : vector<16x32xf32> to vector<16x32xbf16>
      %c0_31 = arith.constant 0 : index
      %c0_32 = arith.constant 0 : index
      %63 = vector.load %arg9[%c0_31, %c0_32] : memref<16x32xbf16, #tpu.memory_space<vmem>>, vector<16x32xbf16>
      tpu.vector_store %arg9[%c0_31, %c0_32], %62 {strides = array<i32>} : memref<16x32xbf16, #tpu.memory_space<vmem>>, vector<16x32xbf16>,
    } else {
    }
    return
  }
  func.func @transform_0(%arg0: i32, %arg1: i32) -> (i32, i32) {
    %c0_i32 = arith.constant 0 : i32
    return %arg0, %arg1 : i32, i32
  }
  func.func @transform_1(%arg0: i32, %arg1: i32) -> (i32, i32) {
    %c0_i32 = arith.constant 0 : i32
    return %arg0, %arg1 : i32, i32
  }
  func.func @transform_2(%arg0: i32, %arg1: i32) -> (i32, i32) {
    %c0_i32 = arith.constant 0 : i32
    %c0_i32_0 = arith.constant 0 : i32
    return %arg1, %c0_i32 : i32, i32
  }
  func.func @transform_3(%arg0: i32, %arg1: i32) -> (i32, i32) {
    %c0_i32 = arith.constant 0 : i32
    %c0_i32_0 = arith.constant 0 : i32
    %c0_i32_1 = arith.constant 0 : i32
    return %c0_i32, %c0_i32_0 : i32, i32
  }
  func.func @transform_4(%arg0: i32, %arg1: i32) -> (i32, i32) {
    %c0_i32 = arith.constant 0 : i32
    %c0_i32_0 = arith.constant 0 : i32
    %c0_i32_1 = arith.constant 0 : i32
    return %c0_i32, %c0_i32_0 : i32, i32
  }
  func.func @transform_5(%arg0: i32, %arg1: i32) -> (i32, i32) {
    %c0_i32 = arith.constant 0 : i32
    %c0_i32_0 = arith.constant 0 : i32
    %c0_i32_1 = arith.constant 0 : i32
    return %c0_i32, %c0_i32_0 : i32, i32
  }
  func.func @transform_6(%arg0: i32, %arg1: i32) -> (i32, i32) {
    %c0_i32 = arith.constant 0 : i32
    %c0_i32_0 = arith.constant 0 : i32
    %c0_i32_1 = arith.constant 0 : i32
    return %c0_i32, %c0_i32_0 : i32, i32
  }
  func.func @transform_7(%arg0: i32, %arg1: i32) -> (i32, i32) {
    %c0_i32 = arith.constant 0 : i32
    %c0_i32_0 = arith.constant 0 : i32
    return %arg0, %c0_i32 : i32, i32
  }
}

module attributes {stable_mosaic.version = 11 : i64} {
  func.func @decoder_kernel(%arg0: i32, %arg1: memref<8x1xi32, #tpu.memory_space<vmem>>, %arg2: memref<8x1xi32, #tpu.memory_space<vmem>>, %arg3: memref<16x32xbf16, #tpu.memory_space<vmem>>, %arg4: memref<24x32xbf16, #tpu.memory_space<vmem>>, %arg5: memref<32x64xbf16, #tpu.memory_space<vmem>>, %arg6: memref<32x64xbf16, #tpu.memory_space<vmem>>, %arg7: memref<32x64xbf16, #tpu.memory_space<vmem>>, %arg8: memref<32x64xbf16, #tpu.memory_space<vmem>>, %arg9: memref<1x64xf32, #tpu.memory_space<vmem>>, %arg10: memref<1x64xf32, #tpu.memory_space<vmem>>, %arg11: memref<1x1xf32, #tpu.memory_space<vmem>>, %arg12: memref<8x1xf32, #tpu.memory_space<vmem>>) attributes {dimension_semantics = [#tpu.dimension_semantics<parallel>], iteration_bounds = array<i64: 1>, scalar_prefetch = 0 : i64, scratch_operands = 0 : i64, tpu.core_type = #tpu.core_type<tc>, window_params = [{transform_indices = @transform_0, window_bounds = array<i64: 8, 1>}, {transform_indices = @transform_1, window_bounds = array<i64: 8, 1>}, {pipeline_mode = #tpu.pipeline_mode<synchronous>, transform_indices = @transform_2, window_bounds = array<i64: 16, 32>}, {pipeline_mode = #tpu.pipeline_mode<synchronous>, transform_indices = @transform_3, window_bounds = array<i64: 24, 32>}, {pipeline_mode = #tpu.pipeline_mode<synchronous>, transform_indices = @transform_4, window_bounds = array<i64: 32, 64>}, {pipeline_mode = #tpu.pipeline_mode<synchronous>, transform_indices = @transform_5, window_bounds = array<i64: 32, 64>}, {pipeline_mode = #tpu.pipeline_mode<synchronous>, transform_indices = @transform_6, window_bounds = array<i64: 32, 64>}, {pipeline_mode = #tpu.pipeline_mode<synchronous>, transform_indices = @transform_7, window_bounds = array<i64: 32, 64>}, {pipeline_mode = #tpu.pipeline_mode<synchronous>, transform_indices = @transform_8, window_bounds = array<i64: 1, 64>}, {pipeline_mode = #tpu.pipeline_mode<synchronous>, transform_indices = @transform_9, window_bounds = array<i64: 1, 64>}, {pipeline_mode = #tpu.pipeline_mode<synchronous>, transform_indices = @transform_10, window_bounds = array<i64: 1, 1>}, {transform_indices = @transform_11, window_bounds = array<i64: 8, 1>}]} {
    %0 = tpu.iota {dimensions = array<i32: 1>} : vector<8x16xi32>
    %c0 = arith.constant 0 : index
    %c0_0 = arith.constant 0 : index
    %1 = vector.load %arg1[%c0, %c0_0] : memref<8x1xi32, #tpu.memory_space<vmem>>, vector<8x1xi32>
    %2 = vector.broadcast %1 : vector<8x1xi32> to vector<8x16xi32>
    %3 = arith.cmpi eq, %0, %2 : vector<8x16xi32>
    %4 = arith.extui %3 : vector<8x16xi1> to vector<8x16xi32>
    %5 = arith.sitofp %4 : vector<8x16xi32> to vector<8x16xf32>
    %6 = arith.truncf %5 : vector<8x16xf32> to vector<8x16xbf16>
    %7 = tpu.iota {dimensions = array<i32: 1>} : vector<8x24xi32>
    %c0_1 = arith.constant 0 : index
    %c0_2 = arith.constant 0 : index
    %8 = vector.load %arg2[%c0_1, %c0_2] : memref<8x1xi32, #tpu.memory_space<vmem>>, vector<8x1xi32>
    %9 = vector.broadcast %8 : vector<8x1xi32> to vector<8x24xi32>
    %10 = arith.cmpi eq, %7, %9 : vector<8x24xi32>
    %11 = arith.extui %10 : vector<8x24xi1> to vector<8x24xi32>
    %12 = arith.sitofp %11 : vector<8x24xi32> to vector<8x24xf32>
    %13 = arith.truncf %12 : vector<8x24xf32> to vector<8x24xbf16>
    %c0_3 = arith.constant 0 : index
    %c0_4 = arith.constant 0 : index
    %14 = vector.load %arg3[%c0_3, %c0_4] : memref<16x32xbf16, #tpu.memory_space<vmem>>, vector<16x32xbf16>
    %cst = arith.constant dense<0.000000e+00> : vector<8x32xf32>
    %15 = tpu.matmul %6, %14, %cst {dimension_numbers = #tpu.dot_dimension_numbers<[1], [0], [0], [1], [0, 0, 1, 1], [], []>} : vector<8x16xbf16>, vector<16x32xbf16>, vector<8x32xf32> -> vector<8x32xf32>
    %c0_5 = arith.constant 0 : index
    %c0_6 = arith.constant 0 : index
    %16 = vector.load %arg4[%c0_5, %c0_6] : memref<24x32xbf16, #tpu.memory_space<vmem>>, vector<24x32xbf16>
    %cst_7 = arith.constant dense<0.000000e+00> : vector<8x32xf32>
    %17 = tpu.matmul %13, %16, %cst_7 {dimension_numbers = #tpu.dot_dimension_numbers<[1], [0], [0], [1], [0, 0, 1, 1], [], []>} : vector<8x24xbf16>, vector<24x32xbf16>, vector<8x32xf32> -> vector<8x32xf32>
    %18 = arith.addf %15, %17 : vector<8x32xf32>
    %19 = arith.truncf %18 : vector<8x32xf32> to vector<8x32xbf16>
    %c0_8 = arith.constant 0 : index
    %c0_9 = arith.constant 0 : index
    %20 = vector.load %arg5[%c0_8, %c0_9] : memref<32x64xbf16, #tpu.memory_space<vmem>>, vector<32x64xbf16>
    %cst_10 = arith.constant dense<0.000000e+00> : vector<8x64xf32>
    %21 = tpu.matmul %19, %20, %cst_10 {dimension_numbers = #tpu.dot_dimension_numbers<[1], [0], [0], [1], [0, 0, 1, 1], [], []>} : vector<8x32xbf16>, vector<32x64xbf16>, vector<8x64xf32> -> vector<8x64xf32>
    %22 = arith.mulf %15, %17 : vector<8x32xf32>
    %23 = arith.truncf %22 : vector<8x32xf32> to vector<8x32xbf16>
    %c0_11 = arith.constant 0 : index
    %c0_12 = arith.constant 0 : index
    %24 = vector.load %arg6[%c0_11, %c0_12] : memref<32x64xbf16, #tpu.memory_space<vmem>>, vector<32x64xbf16>
    %cst_13 = arith.constant dense<0.000000e+00> : vector<8x64xf32>
    %25 = tpu.matmul %23, %24, %cst_13 {dimension_numbers = #tpu.dot_dimension_numbers<[1], [0], [0], [1], [0, 0, 1, 1], [], []>} : vector<8x32xbf16>, vector<32x64xbf16>, vector<8x64xf32> -> vector<8x64xf32>
    %26 = arith.addf %21, %25 : vector<8x64xf32>
    %27 = arith.truncf %15 : vector<8x32xf32> to vector<8x32xbf16>
    %c0_14 = arith.constant 0 : index
    %c0_15 = arith.constant 0 : index
    %28 = vector.load %arg7[%c0_14, %c0_15] : memref<32x64xbf16, #tpu.memory_space<vmem>>, vector<32x64xbf16>
    %cst_16 = arith.constant dense<0.000000e+00> : vector<8x64xf32>
    %29 = tpu.matmul %27, %28, %cst_16 {dimension_numbers = #tpu.dot_dimension_numbers<[1], [0], [0], [1], [0, 0, 1, 1], [], []>} : vector<8x32xbf16>, vector<32x64xbf16>, vector<8x64xf32> -> vector<8x64xf32>
    %30 = arith.addf %26, %29 : vector<8x64xf32>
    %31 = arith.truncf %17 : vector<8x32xf32> to vector<8x32xbf16>
    %c0_17 = arith.constant 0 : index
    %c0_18 = arith.constant 0 : index
    %32 = vector.load %arg8[%c0_17, %c0_18] : memref<32x64xbf16, #tpu.memory_space<vmem>>, vector<32x64xbf16>
    %cst_19 = arith.constant dense<0.000000e+00> : vector<8x64xf32>
    %33 = tpu.matmul %31, %32, %cst_19 {dimension_numbers = #tpu.dot_dimension_numbers<[1], [0], [0], [1], [0, 0, 1, 1], [], []>} : vector<8x32xbf16>, vector<32x64xbf16>, vector<8x64xf32> -> vector<8x64xf32>
    %34 = arith.addf %30, %33 : vector<8x64xf32>
    %c0_20 = arith.constant 0 : index
    %c0_21 = arith.constant 0 : index
    %35 = vector.load %arg9[%c0_20, %c0_21] : memref<1x64xf32, #tpu.memory_space<vmem>>, vector<1x64xf32>
    %36 = vector.broadcast %35 : vector<1x64xf32> to vector<8x64xf32>
    %37 = arith.addf %34, %36 : vector<8x64xf32>
    %cst_22 = arith.constant 0.000000e+00 : f32
    %38 = vector.broadcast %cst_22 : f32 to vector<8x64xf32>
    %39 = arith.maximumf %37, %38 : vector<8x64xf32>
    %c0_23 = arith.constant 0 : index
    %c0_24 = arith.constant 0 : index
    %40 = vector.load %arg10[%c0_23, %c0_24] : memref<1x64xf32, #tpu.memory_space<vmem>>, vector<1x64xf32>
    %41 = vector.broadcast %40 : vector<1x64xf32> to vector<8x64xf32>
    %42 = arith.mulf %39, %41 : vector<8x64xf32>
    %cst_25 = arith.constant dense<0.000000e+00> : vector<8xf32>
    %43 = vector.multi_reduction <add>, %42, %cst_25 [1] : vector<8x64xf32> to vector<8xf32>
    %44 = vector.shape_cast %43 : vector<8xf32> to vector<8x1xf32>
    %c0_26 = arith.constant 0 : index
    %c0_27 = arith.constant 0 : index
    %45 = vector.load %arg11[%c0_26, %c0_27] : memref<1x1xf32, #tpu.memory_space<vmem>>, vector<1x1xf32>
    %46 = vector.broadcast %45 : vector<1x1xf32> to vector<8x1xf32>
    %47 = arith.addf %44, %46 : vector<8x1xf32>
    %c0_28 = arith.constant 0 : index
    %c0_29 = arith.constant 0 : index
    %48 = vector.load %arg12[%c0_28, %c0_29] : memref<8x1xf32, #tpu.memory_space<vmem>>, vector<8x1xf32>
    tpu.vector_store %arg12[%c0_28, %c0_29], %47 {strides = array<i32>} : memref<8x1xf32, #tpu.memory_space<vmem>>, vector<8x1xf32>,
    return
  }
  func.func @transform_0(%arg0: i32) -> (i32, i32) {
    %c0_i32 = arith.constant 0 : i32
    %c0_i32_0 = arith.constant 0 : i32
    return %arg0, %c0_i32 : i32, i32
  }
  func.func @transform_1(%arg0: i32) -> (i32, i32) {
    %c0_i32 = arith.constant 0 : i32
    %c0_i32_0 = arith.constant 0 : i32
    return %arg0, %c0_i32 : i32, i32
  }
  func.func @transform_2(%arg0: i32) -> (i32, i32) {
    %c0_i32 = arith.constant 0 : i32
    %c0_i32_0 = arith.constant 0 : i32
    %c0_i32_1 = arith.constant 0 : i32
    return %c0_i32, %c0_i32_0 : i32, i32
  }
  func.func @transform_3(%arg0: i32) -> (i32, i32) {
    %c0_i32 = arith.constant 0 : i32
    %c0_i32_0 = arith.constant 0 : i32
    %c0_i32_1 = arith.constant 0 : i32
    return %c0_i32, %c0_i32_0 : i32, i32
  }
  func.func @transform_4(%arg0: i32) -> (i32, i32) {
    %c0_i32 = arith.constant 0 : i32
    %c0_i32_0 = arith.constant 0 : i32
    %c0_i32_1 = arith.constant 0 : i32
    return %c0_i32, %c0_i32_0 : i32, i32
  }
  func.func @transform_5(%arg0: i32) -> (i32, i32) {
    %c0_i32 = arith.constant 0 : i32
    %c0_i32_0 = arith.constant 0 : i32
    %c0_i32_1 = arith.constant 0 : i32
    return %c0_i32, %c0_i32_0 : i32, i32
  }
  func.func @transform_6(%arg0: i32) -> (i32, i32) {
    %c0_i32 = arith.constant 0 : i32
    %c0_i32_0 = arith.constant 0 : i32
    %c0_i32_1 = arith.constant 0 : i32
    return %c0_i32, %c0_i32_0 : i32, i32
  }
  func.func @transform_7(%arg0: i32) -> (i32, i32) {
    %c0_i32 = arith.constant 0 : i32
    %c0_i32_0 = arith.constant 0 : i32
    %c0_i32_1 = arith.constant 0 : i32
    return %c0_i32, %c0_i32_0 : i32, i32
  }
  func.func @transform_8(%arg0: i32) -> (i32, i32) {
    %c0_i32 = arith.constant 0 : i32
    %c0_i32_0 = arith.constant 0 : i32
    %c0_i32_1 = arith.constant 0 : i32
    return %c0_i32, %c0_i32_0 : i32, i32
  }
  func.func @transform_9(%arg0: i32) -> (i32, i32) {
    %c0_i32 = arith.constant 0 : i32
    %c0_i32_0 = arith.constant 0 : i32
    %c0_i32_1 = arith.constant 0 : i32
    return %c0_i32, %c0_i32_0 : i32, i32
  }
  func.func @transform_10(%arg0: i32) -> (i32, i32) {
    %c0_i32 = arith.constant 0 : i32
    %c0_i32_0 = arith.constant 0 : i32
    %c0_i32_1 = arith.constant 0 : i32
    return %c0_i32, %c0_i32_0 : i32, i32
  }
  func.func @transform_11(%arg0: i32) -> (i32, i32) {
    %c0_i32 = arith.constant 0 : i32
    %c0_i32_0 = arith.constant 0 : i32
    return %arg0, %c0_i32 : i32, i32
  }
}

</mosaic_0001>

<bundles_post_ra>
// kernel: mgcna_forward.10
= control target key start
LH: loop header
LB: loop body
LE: loop exit
PB: predicated region body
PF: predicated region fallthrough
CT: control target
= control target key end

     0   :  { %7 = vsyncpa [#allocation3], 0  ;;  %s140_s12 = smov [#allocation2]   ;;  %s141_s14 = smov 64   ;;  %s176_s0 = inlined_call_operand.hbm [shape: bf16[24,32], index: 0, kind: input, shape index: {}]   ;;  %s177_s1 = inlined_call_operand.vmem [shape: bf16[32,96], index: 1, kind: input, shape index: {}]   ;;  %s178_s2 = inlined_call_operand.vmem [shape: bf16[24,96], index: 2, kind: output, shape index: {}]  }
   0x1   :  { %s12_s11 = sshll.u32 %s176_s0, 4  ;;  %s14_s13 = sshll.u32 %s140_s12, 4  ;;  %s13_s11 = int_to_ptr.hbm [resolvable:$true] %s12_s11  ;;  %s15_s13 = int_to_ptr.vmem [resolvable:$true] %s14_s13 }
   0x2   :  { %s142_s15 = smov 4  }
   0x3   :  { %20 = dma.hbm_to_vmem [thread:$0]  %s13_s11, 192, %s15_s13, [#allocation3], %s141_s14, %s141_s14, %s142_s15  }
   0x4   :  { %138 = dma.done.wait [#allocation3], 192  }
   0x5   :  { %139 = vsyncadd [#allocation3], 4294967104  ;;  %v108_v0 = vld [vmem:[%s177_s1 + $0x8] sm:$0xff]  ;;  %v107_v2 = vld [vmem:[%s177_s1] sm:$0xff]  ;;  %vm55_vm0 = vcmask 261120   ;;  %vm83_vm1 = vcmask 781312  }
   0x6   :  { %v30_v1 = vld [vmem:[#allocation2 + $0x8] sm:$0xf]  ;;  %68 = vmatpush.bf16.msra.mxu0 %v108_v0  ;;  %109 = vmatpush.bf16.msra.mxu1 %v108_v0  ;;  %v106_v4 = vld [vmem:[#allocation2] sm:$0xff] }
   0x7   :  { %v40_v3 = vunpack.c.l.b16 %v30_v1 }
   0x9   :  { %v42_v5 = vpack.c.b16 %v40_v3, %v40_v3 }
   0xa   :  { %69 = vmatpush.bf16.msra.mxu0 %v107_v2  ;;  %110 = vmatpush.bf16.msra.mxu1 %v107_v2 }
   0xd   :  { %104 = vmatmul.msk.bf16.vlgmr.msra.gmra.mxu0 %vm55_vm0, %v106_v4  ;;  %105 = vmatmul.msk.bf16.vlgmr.msra.gmra.mxu1 %vm55_vm0, %v42_v5 }
  0x8a   :  { %v71_v6 = vpop.f32.mrf.mxu0  ;;  %v76_v7 = vpop.f32.mrf.mxu1 }
  0x8b   :  { %v80_v8 = vpack.c.bf16 %v71_v6, %v71_v6  ;;  %v82_v9 = vpack.c.bf16 %v76_v7, %v76_v7 }
  0x8d   :  { %84 = vst.msk [vmem:[%s178_s2] sm:$0xf] %vm83_vm1, %v80_v8 }
  0x8e   :  { %86 = vst.msk [vmem:[%s178_s2 + $0x8] sm:$0xf] %vm83_vm1, %v82_v9 }
  0x92   :  { %v73_v10 = vpop.f32.mrf.mxu0  ;;  %v78_v11 = vpop.f32.mrf.mxu1 }
  0x93   :  { %v81_v12 = vpack.c.bf16 %v73_v10, %v73_v10 }
  0x95   :  { %85 = vst.msk [vmem:[%s178_s2 + $0x4] sm:$0xf] %vm83_vm1, %v81_v12 }
  0x96   :  { %91 = vsyncpa [#allocation3], 1 }

// kernel: mgcna_forward.7
= control target key start
LH: loop header
LB: loop body
LE: loop exit
PB: predicated region body
PF: predicated region fallthrough
CT: control target
= control target key end

     0   :  { %7 = vsyncpa [#allocation3], 0  ;;  %s199_s0 = inlined_call_operand.hbm [shape: bf16[16,32], index: 0, kind: input, shape index: {}]   ;;  %s200_s1 = inlined_call_operand.hbm [shape: bf16[32,64], index: 1, kind: input, shape index: {}]   ;;  %s201_s2 = inlined_call_operand.vmem [shape: bf16[16,64], index: 2, kind: output, shape index: {}]  }
   0x1   :  { %s13_s11 = sshll.u32 %s199_s0, 4  ;;  %s14_s11 = int_to_ptr.hbm [resolvable:$true] %s13_s11 }
   0x2   :  { %8 = vsyncpa [#allocation5], 0  ;;  %s168_s12 = smov [#allocation2]   ;;  %s26_s16 = sshll.u32 %s200_s1, 4  ;;  %s27_s16 = int_to_ptr.hbm [resolvable:$true] %s26_s16 }
   0x3   :  { %s15_s13 = sshll.u32 %s168_s12, 4  ;;  %s169_s17 = smov 64   ;;  %s16_s13 = int_to_ptr.vmem [resolvable:$true] %s15_s13 }
   0x4   :  { %s170_s18 = smov 4   ;;  %s171_s19 = smov [#allocation4]  }
   0x5   :  { %21 = dma.hbm_to_vmem [thread:$0]  %s14_s11, 128, %s16_s13, [#allocation3], %s169_s17, %s169_s17, %s170_s18  }
   0x6   :  { %s28_s20 = sshll.u32 %s171_s19, 4  ;;  %s29_s20 = int_to_ptr.vmem [resolvable:$true] %s28_s20 }
   0x7   :  { %34 = dma.hbm_to_vmem [thread:$0]  %s27_s16, 256, %s29_s20, [#allocation5], %s169_s17, %s169_s17, %s170_s18  }
   0x8   :  { %164 = dma.done.wait [#allocation3], 128  }
   0x9   :  { %165 = vsyncadd [#allocation3], 4294967168 }
   0xa   :  { %166 = dma.done.wait [#allocation5], 256  }
   0xb   :  { %167 = vsyncadd [#allocation5], 4294967040  ;;  %v111_v0 = vld [vmem:[#allocation4 + $0x8] sm:$0xff]  ;;  %v110_v1 = vld [vmem:[#allocation4] sm:$0xff]  ;;  %vm67_vm0 = vcmask 261120   ;;  %vm87_vm1 = vcmask 519168  }
   0xc   :  { %77 = vmatpush.bf16.msra.mxu0 %v111_v0  ;;  %v109_v2 = vld [vmem:[#allocation2] sm:$0xff] }
  0x10   :  { %78 = vmatpush.bf16.msra.mxu0 %v110_v1 }
  0x13   :  { %108 = vmatmul.msk.bf16.vlgmr.msra.gmra.mxu0 %vm67_vm0, %v109_v2 }
  0x90   :  { %v80_v3 = vpop.f32.mrf.mxu0 }
  0x91   :  { %v85_v4 = vpack.c.bf16 %v80_v3, %v80_v3 }
  0x93   :  { %88 = vst.msk [vmem:[%s201_s2] sm:$0xf] %vm87_vm1, %v85_v4 }
  0x98   :  { %v82_v5 = vpop.f32.mrf.mxu0 }
  0x99   :  { %v86_v6 = vpack.c.bf16 %v82_v5, %v82_v5 }
  0x9b   :  { %89 = vst.msk [vmem:[%s201_s2 + $0x4] sm:$0xf] %vm87_vm1, %v86_v6 }
  0x9c   :  { %94 = vsyncpa [#allocation3], 1 }
  0x9d   :  { %95 = vsyncpa [#allocation5], 1 }

// kernel: mgcna_forward.11
= control target key start
LH: loop header
LB: loop body
LE: loop exit
PB: predicated region body
PF: predicated region fallthrough
CT: control target
= control target key end

     0   :  { %11 = vsyncpa [#allocation4], 0  ;;  %s807_s0 = inlined_call_operand.vmem [shape: bf16[24,24], index: 0, kind: input, shape index: {}]   ;;  %s808_s1 = inlined_call_operand.hbm [shape: bf16[24,24], index: 1, kind: input, shape index: {}]   ;;  %s809_s2 = inlined_call_operand.hbm [shape: bf16[24,24], index: 2, kind: input, shape index: {}]   ;;  %s810_s3 = inlined_call_operand.vmem [shape: bf16[24,96], index: 3, kind: input, shape index: {}]   ;;  %s811_s4 = inlined_call_operand.hbm [shape: f32[1,96], index: 4, kind: input, shape index: {}]   ;;  %s812_s5 = inlined_call_operand.hbm [shape: bf16[3,32,32], index: 5, kind: input, shape index: {}]   ;;  %s813_s6 = inlined_call_operand.vmem [shape: bf16[24,96], index: 6, kind: output, shape index: {}]  }
   0x1   :  { %12 = vsyncpa [#allocation6], 0 }
   0x2   :  { %13 = vsyncpa [#allocation9], 0  ;;  %s33_s23 = sshll.u32 %s809_s2, 4  ;;  %s665_s24 = smov [#allocation5]   ;;  %s34_s23 = int_to_ptr.hbm [resolvable:$true] %s33_s23 }
   0x3   :  { %s35_s25 = sshll.u32 %s665_s24, 4  ;;  %s20_s28 = sshll.u32 %s808_s1, 4  ;;  %s36_s25 = int_to_ptr.vmem [resolvable:$true] %s35_s25  ;;  %s21_s28 = int_to_ptr.hbm [resolvable:$true] %s20_s28 }
   0x4   :  { %s666_s29 = smov 64   ;;  %s667_s30 = smov 4  }
   0x5   :  { %41 = dma.hbm_to_vmem [thread:$0]  %s34_s23, 192, %s36_s25, [#allocation6], %s666_s29, %s666_s29, %s667_s30  }
   0x6   :  { %s668_s7 = smov [#allocation3]   ;;  %s49_s2 = sshll.u32 %s811_s4, 4  ;;  %s50_s2 = int_to_ptr.hbm [resolvable:$true] %s49_s2 }
   0x7   :  { %s22_s8 = sshll.u32 %s668_s7, 4  ;;  %s59_s1 = sshll.u32 %s812_s5, 4  ;;  %s23_s8 = int_to_ptr.vmem [resolvable:$true] %s22_s8  ;;  %s60_s1 = int_to_ptr.hbm [resolvable:$true] %s59_s1 }
   0x8   :  { %28 = dma.hbm_to_vmem [thread:$0]  %s21_s28, 192, %s23_s8, [#allocation4], %s666_s29, %s666_s29, %s667_s30  }
   0x9   :  { %s669_s13 = smov [#allocation7]   ;;  %s670_s15 = smov [#allocation8]  }
   0xa   :  { %s51_s14 = sshll.u32 %s669_s13, 4  ;;  %s61_s16 = sshll.u32 %s670_s15, 4  ;;  %s52_s14 = int_to_ptr.vmem [resolvable:$true] %s51_s14  ;;  %s62_s16 = int_to_ptr.vmem [resolvable:$true] %s61_s16 }
   0xb   :  { %54 = dma.hbm_to_vmem [thread:$0]  %s50_s2, 16, %s52_s14, [#allocation6]  }
   0xc   :  { %67 = dma.hbm_to_vmem [thread:$0]  %s60_s1, 768, %s62_s16, [#allocation9], %s666_s29, %s666_s29, %s667_s30  }
   0xd   :  { %659 = dma.done.wait [#allocation4], 192  }
   0xe   :  { %660 = vsyncadd [#allocation4], 4294967104 }
   0xf   :  { %661 = dma.done.wait [#allocation6], 208  }
  0x10   :  { %662 = vsyncadd [#allocation6], 4294967088 }
  0x11   :  { %663 = dma.done.wait [#allocation9], 768  }
  0x12   :  { %664 = vsyncadd [#allocation9], 4294966528  ;;  %v95_v0 = vld [vmem:[%s810_s3 + $0x8] sm:$0xf]  ;;  %v539_v1 = vld [vmem:[%s810_s3] sm:$0xff]  ;;  %s671_s19 = smov 96  }
  0x13   :  { %v115_v2 = vunpack.c.l.b16 %v95_v0  ;;  %169 = vrot.lane.b32.xlu1 %v539_v1, %s671_s19  ;;  %vm126_vm0 = vcmask 1043456   ;;  %v101_v5 = vld [vmem:[%s807_s0 + $0x8] sm:$0xf]  ;;  %vm119_vm1 = vcmask 195584   ;;  %v160_v8 = vld [vmem:[#allocation3 + $0x8] sm:$0xf] }
  0x14   :  { %v107_v6 = vunpack.c.l.b16 %v101_v5  ;;  %v166_v12 = vunpack.c.l.b16 %v160_v8  ;;  %v540_v13 = vld [vmem:[%s807_s0] sm:$0xff]  ;;  %vm89_vm2 = vcmask 785408   ;;  %v672_v14 = vmov 0.0   ;;  %v541_v15 = vld [vmem:[#allocation3] sm:$0xff]  ;;  %v225_v21 = vld [vmem:[#allocation5 + $0x8] sm:$0xf] }
  0x15   :  { %v117_v3 = vpack.c.b16 %v115_v2, %v115_v2  ;;  %92 = vst.msk [vmem:[#allocation2 + $0x10] sm:$0xff] %vm89_vm2, %v672_v14  ;;  %v542_v20 = vld [vmem:[#allocation5] sm:$0xff]  ;;  %v231_v22 = vunpack.c.l.b16 %v225_v21  ;;  %vm151_vm3 = vcmask 261120   ;;  %s673_s0 = smov 32   ;;  %vm216_vm4 = vcmask 523520   ;;  %v544_v51 = vld [vmem:[#allocation8 + $0x8] sm:$0xff] }
  0x16   :  { %v109_v7 = vpack.c.b16 %v107_v6, %v107_v6  ;;  %90 = vst.msk [vmem:[#allocation2] sm:$0xff] %vm89_vm2, %v672_v14  ;;  %v168_v16 = vpack.c.b16 %v166_v12, %v166_v12  ;;  %v543_v52 = vld [vmem:[#allocation8] sm:$0xff]  ;;  %vm281_vm5 = vcmask 785920   ;;  %v548_v59 = vld [vmem:[#allocation8 + $0x28] sm:$0xff]  ;;  %v562_v61 = vld [vmem:[#allocation7] ss:$0 sm:$0xff] }
  0x17   :  { %171 = vrot.lane.b32.xlu0 %v117_v3, %s671_s19  ;;  %v128_v4 = vsel %vm126_vm0, %v117_v3, 0  ;;  %91 = vst.msk [vmem:[#allocation2 + $0x8] sm:$0xff] %vm89_vm2, %v672_v14  ;;  %v233_v23 = vpack.c.b16 %v231_v22, %v231_v22  ;;  %v547_v60 = vld [vmem:[#allocation8 + $0x20] sm:$0xff]  ;;  %v546_v12 = vld [vmem:[#allocation8 + $0x18] sm:$0xff]  ;;  %vm346_vm6 = vcmask 257024   ;;  %vm412_vm7 = vcmask 519424  }
  0x18   :  { %549 = vmatpush.bf16.msra.mxu2 %v128_v4  ;;  %136 = vmatpush.bf16.msra.mxu0 %v128_v4  ;;  %vm476_vm8 = vcmask 781824  }
  0x1b   :  { %234 = vrot.lane.b32.xlu1 %v539_v1, %s666_s29 }
  0x1c   :  { %550 = vmatpush.bf16.msra.mxu2 %v539_v1  ;;  %137 = vmatpush.bf16.msra.mxu0 %v539_v1  ;;  %v98_v24 = vld [vmem:[#allocation2 + $0x10] sm:$0xff] }
  0x1d   :  { %v96_v37 = vld [vmem:[#allocation2] sm:$0xff] }
  0x1e   :  { %v97_v38 = vld [vmem:[#allocation2 + $0x8] sm:$0xff] }
  0x1f   :  { %236 = vrot.lane.b32.xlu0 %v117_v3, %s666_s29  ;;  %496 = vmatmul.msk.bf16.vlgmr.msra.gmra.mxu2 %vm119_vm1, %v109_v7 }
  0x20   :  { %495 = vmatmul.msk.bf16.vlgmr.msra.gmra.mxu0 %vm119_vm1, %v540_v13  ;;  %v545_v13 = vld [vmem:[#allocation8 + $0x10] sm:$0xff] }
  0x21   :  { %385 = vmatpush.bf16.msrb.mxu0 %v546_v12 }
  0x25   :  { %386 = vmatpush.bf16.msrb.mxu0 %v545_v13 }
  0x85   :  { %v170_v11 = vpop.permute.xlu1 %169 }
  0x89   :  { %v172_v9 = vpop.permute.xlu0 %171 }
  0x8a   :  { %v181_v10 = vsel %vm126_vm0, %v172_v9, 0 }
  0x8b   :  { %189 = vmatpush.bf16.msra.mxu1 %v181_v10  ;;  %551 = vmatpush.bf16.msra.mxu3 %v181_v10 }
  0x8d   :  { %v235_v19 = vpop.permute.xlu1 %234 }
  0x8f   :  { %190 = vmatpush.bf16.msra.mxu1 %v170_v11  ;;  %552 = vmatpush.bf16.msra.mxu3 %v170_v11 }
  0x91   :  { %v237_v17 = vpop.permute.xlu0 %236 }
  0x92   :  { %501 = vmatmul.msk.bf16.vlgmr.msra.gmra.mxu1 %vm119_vm1, %v541_v15  ;;  %v246_v18 = vsel %vm126_vm0, %v237_v17, 0  ;;  %502 = vmatmul.msk.bf16.vlgmr.msra.gmra.mxu3 %vm119_vm1, %v168_v16 }
  0x93   :  { %254 = vmatpush.bf16.msrb.mxu2 %v246_v18  ;;  %331 = vmatpush.bf16.msrb.mxu3 %v544_v51 }
  0x94   :  { %449 = vmatpush.bf16.msrb.mxu1 %v548_v59 }
  0x97   :  { %255 = vmatpush.bf16.msrb.mxu2 %v235_v19  ;;  %332 = vmatpush.bf16.msrb.mxu3 %v543_v52 }
  0x98   :  { %450 = vmatpush.bf16.msrb.mxu1 %v547_v60 }
  0x9a   :  { %507 = vmatmul.msk.bf16.vlgmr.msrb.gmra.mxu2 %vm119_vm1, %v542_v20 }
  0x9d   :  { %v139_v36 = vpop.f32.mrf.mxu0 }
  0x9e   :  { %v148_v40 = vadd.f32 %v139_v36, %v96_v37 }
  0xa0   :  { %152 = vst.msk [vmem:[#allocation2] sm:$0xff] %vm151_vm3, %v148_v40 }
  0xa2   :  { %v144_v25 = vpop.f32.mrf.mxu2 }
  0xa3   :  { %v150_v26 = vadd.f32 %v144_v25, %v98_v24 }
  0xa5   :  { %154 = vst.msk [vmem:[#allocation2 + $0x10] sm:$0xff] %vm151_vm3, %v150_v26  ;;  %v141_v39 = vpop.f32.mrf.mxu0 }
  0xa6   :  { %v149_v41 = vadd.f32 %v141_v39, %v97_v38 }
  0xa7   :  { %v155_v42 = vld [vmem:[#allocation2] sm:$0xff] }
  0xa8   :  { %153 = vst.msk [vmem:[#allocation2 + $0x8] sm:$0xff] %vm151_vm3, %v149_v41 }
  0xaa   :  { %508 = vmatmul.msk.bf16.gmra.mxu2 %vm119_vm1, %v233_v23  ;;  %v146_v27 = vpop.f32.mrf.mxu2 }
  0xac   :  { %v157_v49 = vld [vmem:[#allocation2 + $0x10] sm:$0xff] }
  0xaf   :  { %v156_v45 = vld [vmem:[#allocation2 + $0x8] sm:$0xff] }
 0x10f   :  { %v192_v28 = vpop.f32.mrf.mxu1 }
 0x110   :  { %204 = vrot.lane.b32.xlu2 %v192_v28, %s673_s0 }
 0x115   :  { %v197_v29 = vpop.f32.mrf.mxu3 }
 0x117   :  { %v194_v30 = vpop.f32.mrf.mxu1 }
 0x118   :  { %206 = vrot.lane.b32.xlu2 %v194_v30, %s673_s0 }
 0x11d   :  { %v257_v31 = vpop.f32.mrf.mxu2  ;;  %v199_v32 = vpop.f32.mrf.mxu3 }
 0x11e   :  { %269 = vrot.lane.b32.xlu0 %v257_v31, %s666_s29 }
 0x120   :  { %208 = vrot.lane.b32.xlu2 %v197_v29, %s673_s0 }
 0x125   :  { %v259_v33 = vpop.f32.mrf.mxu2 }
 0x126   :  { %271 = vrot.lane.b32.xlu1 %v259_v33, %s666_s29 }
 0x12d   :  { %v262_v34 = vpop.f32.mrf.mxu2 }
 0x12e   :  { %273 = vrot.lane.b32.xlu0 %v262_v34, %s666_s29 }
 0x135   :  { %v264_v35 = vpop.f32.mrf.mxu2 }
 0x16a   :  { %v205_v43 = vpop.permute.xlu2 %204 }
 0x16b   :  { %v213_v44 = vadd.f32 %v205_v43, %v155_v42 }
 0x16d   :  { %217 = vst.msk [vmem:[#allocation2] sm:$0xff] %vm216_vm4, %v213_v44 }
 0x172   :  { %v207_v46 = vpop.permute.xlu2 %206 }
 0x173   :  { %v214_v47 = vadd.f32 %v207_v46, %v156_v45 }
 0x174   :  { %v220_v53 = vld [vmem:[#allocation2] sm:$0xff] }
 0x175   :  { %218 = vst.msk [vmem:[#allocation2 + $0x8] sm:$0xff] %vm216_vm4, %v214_v47 }
 0x17a   :  { %v209_v48 = vpop.permute.xlu2 %208 }
 0x17b   :  { %v215_v50 = vadd.f32 %v209_v48, %v157_v49 }
 0x17c   :  { %v221_v57 = vld [vmem:[#allocation2 + $0x8] sm:$0xff] }
 0x17d   :  { %219 = vst.msk [vmem:[#allocation2 + $0x10] sm:$0xff] %vm216_vm4, %v215_v50 }
 0x184   :  { %v222_v0 = vld [vmem:[#allocation2 + $0x10] sm:$0xff] }
 0x190   :  { %v270_v54 = vpop.permute.xlu0 %269 }
 0x191   :  { %v278_v55 = vadd.f32 %v270_v54, %v220_v53 }
 0x193   :  { %282 = vst.msk [vmem:[#allocation2] sm:$0xff] %vm281_vm5, %v278_v55 }
 0x198   :  { %v272_v56 = vpop.permute.xlu1 %271 }
 0x199   :  { %v279_v58 = vadd.f32 %v272_v56, %v221_v57 }
 0x19a   :  { %v288_v62 = vld [vmem:[#allocation2] sm:$0xff] }
 0x19b   :  { %283 = vst.msk [vmem:[#allocation2 + $0x8] sm:$0xff] %vm281_vm5, %v279_v58  ;;  %v295_v2 = vadd.f32 %v562_v61, %v288_v62 }
 0x19d   :  { %v298_v5 = vmax.f32 %v295_v2, 0.0 }
 0x1a0   :  { %v274_v63 = vpop.permute.xlu0 %273 }
 0x1a1   :  { %v280_v1 = vadd.f32 %v274_v63, %v222_v0 }
 0x1a2   :  { %v289_v3 = vld [vmem:[#allocation2 + $0x8] sm:$0xff] }
 0x1a3   :  { %284 = vst.msk [vmem:[#allocation2 + $0x10] sm:$0xff] %vm281_vm5, %v280_v1  ;;  %v296_v4 = vadd.f32 %v562_v61, %v289_v3 }
 0x1a5   :  { %v299_v6 = vmax.f32 %v296_v4, 0.0 }
 0x1a7   :  { %v301_v7 = vpack.c.bf16 %v299_v6, %v298_v5 }
 0x1a9   :  { %421 = vrot.lane.b32.xlu2 %v301_v7, %s666_s29  ;;  %357 = vrot.lane.b32.xlu1 %v301_v7, %s671_s19 }
 0x1aa   :  { %517 = vmatmul.msk.bf16.vlgmr.msrb.gmra.mxu3 %vm151_vm3, %v301_v7  ;;  %v290_v8 = vld [vmem:[#allocation2 + $0x10] sm:$0xff] }
 0x1ab   :  { %v297_v9 = vadd.f32 %v562_v61, %v290_v8 }
 0x1ad   :  { %v300_v10 = vmax.f32 %v297_v9, 0.0 }
 0x1af   :  { %v302_v11 = vpack.c.bf16 %v300_v10, %v300_v10 }
 0x1b1   :  { %359 = vrot.lane.b32.xlu0 %v302_v11, %s671_s19  ;;  %423 = vrot.lane.b32.xlu1 %v302_v11, %s666_s29 }
 0x1ba   :  { %518 = vmatmul.msk.bf16.gmra.mxu3 %vm151_vm3, %v302_v11 }
 0x203   :  { %v422_v14 = vpop.permute.xlu2 %421 }
 0x204   :  { %537 = vmatmul.msk.bf16.vlgmr.msrb.gmra.mxu1 %vm151_vm3, %v422_v14 }
 0x21b   :  { %v358_v15 = vpop.permute.xlu1 %357 }
 0x21c   :  { %527 = vmatmul.msk.bf16.vlgmr.msrb.gmra.mxu0 %vm151_vm3, %v358_v15 }
 0x223   :  { %v424_v16 = vpop.permute.xlu1 %423  ;;  %v360_v17 = vpop.permute.xlu0 %359 }
 0x224   :  { %538 = vmatmul.msk.bf16.gmra.mxu1 %vm151_vm3, %v424_v16 }
 0x22c   :  { %528 = vmatmul.msk.bf16.gmra.mxu0 %vm151_vm3, %v360_v17 }
 0x22d   :  { %v334_v18 = vpop.f32.mrf.mxu3 }
 0x22e   :  { %v343_v19 = vpack.c.bf16 %v334_v18, %v334_v18 }
 0x230   :  { %347 = vst.msk [vmem:[%s813_s6] sm:$0xf] %vm346_vm6, %v343_v19 }
 0x235   :  { %v336_v20 = vpop.f32.mrf.mxu3 }
 0x236   :  { %v344_v21 = vpack.c.bf16 %v336_v20, %v336_v20 }
 0x238   :  { %348 = vst.msk [vmem:[%s813_s6 + $0x4] sm:$0xf] %vm346_vm6, %v344_v21 }
 0x23d   :  { %v339_v22 = vpop.f32.mrf.mxu3 }
 0x23e   :  { %v345_v23 = vpack.c.bf16 %v339_v22, %v339_v22 }
 0x240   :  { %349 = vst.msk [vmem:[%s813_s6 + $0x8] sm:$0xf] %vm346_vm6, %v345_v23 }
 0x245   :  { %v341_v24 = vpop.f32.mrf.mxu3 }
 0x281   :  { %v452_v25 = vpop.f32.mrf.mxu1 }
 0x282   :  { %v461_v31 = vpack.c.bf16 %v452_v25, %v452_v25 }
 0x289   :  { %v454_v26 = vpop.f32.mrf.mxu1 }
 0x28a   :  { %v462_v35 = vpack.c.bf16 %v454_v26, %v454_v26 }
 0x299   :  { %v388_v27 = vpop.f32.mrf.mxu0 }
 0x29a   :  { %v397_v28 = vpack.c.bf16 %v388_v27, %v388_v27 }
 0x29c   :  { %403 = vrot.lane.b32.xlu2 %v397_v28, %s673_s0 }
 0x2a1   :  { %v390_v29 = vpop.f32.mrf.mxu0  ;;  %v457_v30 = vpop.f32.mrf.mxu1 }
 0x2a2   :  { %v398_v32 = vpack.c.bf16 %v390_v29, %v390_v29  ;;  %v463_v38 = vpack.c.bf16 %v457_v30, %v457_v30 }
 0x2a4   :  { %467 = vrot.lane.b32.xlu2 %v461_v31, %s666_s29  ;;  %405 = vrot.lane.b32.xlu0 %v398_v32, %s673_s0 }
 0x2a9   :  { %v393_v33 = vpop.f32.mrf.mxu0  ;;  %v459_v34 = vpop.f32.mrf.mxu1 }
 0x2aa   :  { %v399_v36 = vpack.c.bf16 %v393_v33, %v393_v33 }
 0x2ac   :  { %469 = vrot.lane.b32.xlu0 %v462_v35, %s666_s29  ;;  %407 = vrot.lane.b32.xlu1 %v399_v36, %s673_s0 }
 0x2b1   :  { %v395_v37 = vpop.f32.mrf.mxu0 }
 0x2b4   :  { %471 = vrot.lane.b32.xlu1 %v463_v38, %s666_s29 }
 0x2f6   :  { %v404_v39 = vpop.permute.xlu2 %403 }
 0x2f7   :  { %413 = vst.msk [vmem:[%s813_s6] sm:$0xf] %vm412_vm7, %v404_v39 }
 0x2fe   :  { %v468_v40 = vpop.permute.xlu2 %467 }
 0x2ff   :  { %477 = vst.msk [vmem:[%s813_s6] sm:$0xf] %vm476_vm8, %v468_v40 }
 0x316   :  { %v406_v41 = vpop.permute.xlu0 %405 }
 0x317   :  { %414 = vst.msk [vmem:[%s813_s6 + $0x4] sm:$0xf] %vm412_vm7, %v406_v41 }
 0x31e   :  { %v470_v42 = vpop.permute.xlu0 %469  ;;  %v408_v43 = vpop.permute.xlu1 %407 }
 0x31f   :  { %478 = vst.msk [vmem:[%s813_s6 + $0x4] sm:$0xf] %vm476_vm8, %v470_v42 }
 0x320   :  { %415 = vst.msk [vmem:[%s813_s6 + $0x8] sm:$0xf] %vm412_vm7, %v408_v43 }
 0x326   :  { %v472_v44 = vpop.permute.xlu1 %471 }
 0x327   :  { %479 = vst.msk [vmem:[%s813_s6 + $0x8] sm:$0xf] %vm476_vm8, %v472_v44 }
 0x328   :  { %484 = vsyncpa [#allocation4], 1 }
 0x329   :  { %485 = vsyncpa [#allocation6], 1 }
 0x32a   :  { %486 = vsyncpa [#allocation9], 1 }

// kernel: mgcna_forward.12
= control target key start
LH: loop header
LB: loop body
LE: loop exit
PB: predicated region body
PF: predicated region fallthrough
CT: control target
= control target key end

     0   :  { %13 = vsyncpa [#allocation4], 0  ;;  %s952_s0 = inlined_call_operand.vmem [shape: bf16[24,24], index: 0, kind: input, shape index: {}]   ;;  %s953_s1 = inlined_call_operand.hbm [shape: bf16[24,24], index: 1, kind: input, shape index: {}]   ;;  %s954_s2 = inlined_call_operand.hbm [shape: bf16[24,24], index: 2, kind: input, shape index: {}]   ;;  %s955_s3 = inlined_call_operand.vmem [shape: bf16[24,96], index: 3, kind: input, shape index: {}]   ;;  %s956_s4 = inlined_call_operand.vmem [shape: f32[1,96], index: 4, kind: input, shape index: {}]   ;;  %s957_s5 = inlined_call_operand.hbm [shape: bf16[32,128], index: 5, kind: input, shape index: {}]   ;;  %s958_s6 = inlined_call_operand.hbm [shape: f32[1,128], index: 6, kind: input, shape index: {}]   ;;  %s959_s7 = inlined_call_operand.hbm [shape: f32[1,128], index: 7, kind: input, shape index: {}]   ;;  %s960_s8 = inlined_call_operand.vmem [shape: bf16[24,32], index: 8, kind: output, shape index: {}]  }
   0x1   :  { %14 = vsyncpa [#allocation6], 0 }
   0x2   :  { %15 = vsyncpa [#allocation9], 0  ;;  %s35_s29 = sshll.u32 %s954_s2, 4  ;;  %s795_s30 = smov [#allocation5]   ;;  %s36_s29 = int_to_ptr.hbm [resolvable:$true] %s35_s29 }
   0x3   :  { %s37_s9 = sshll.u32 %s795_s30, 4  ;;  %s66_s12 = sshll.u32 %s958_s6, 4  ;;  %s38_s9 = int_to_ptr.vmem [resolvable:$true] %s37_s9  ;;  %s67_s12 = int_to_ptr.hbm [resolvable:$true] %s66_s12 }
   0x4   :  { %s796_s13 = smov 64   ;;  %s797_s14 = smov 4  }
   0x5   :  { %43 = dma.hbm_to_vmem [thread:$0]  %s36_s29, 192, %s38_s9, [#allocation6], %s796_s13, %s796_s13, %s797_s14  }
   0x6   :  { %s798_s15 = smov [#allocation8]   ;;  %s22_s2 = sshll.u32 %s953_s1, 4  ;;  %s23_s2 = int_to_ptr.hbm [resolvable:$true] %s22_s2 }
   0x7   :  { %s68_s16 = sshll.u32 %s798_s15, 4  ;;  %s52_s21 = sshll.u32 %s957_s5, 4  ;;  %s69_s16 = int_to_ptr.vmem [resolvable:$true] %s68_s16  ;;  %s53_s21 = int_to_ptr.hbm [resolvable:$true] %s52_s21 }
   0x8   :  { %71 = dma.hbm_to_vmem [thread:$0]  %s67_s12, 16, %s69_s16, [#allocation9]  }
   0x9   :  { %s799_s6 = smov [#allocation3]   ;;  %s800_s23 = smov [#allocation7]  }
   0xa   :  { %s24_s22 = sshll.u32 %s799_s6, 4  ;;  %s54_s24 = sshll.u32 %s800_s23, 4  ;;  %s25_s22 = int_to_ptr.vmem [resolvable:$true] %s24_s22  ;;  %s55_s24 = int_to_ptr.vmem [resolvable:$true] %s54_s24 }
   0xb   :  { %30 = dma.hbm_to_vmem [thread:$0]  %s23_s2, 192, %s25_s22, [#allocation4], %s796_s13, %s796_s13, %s797_s14  }
   0xc   :  { %s77_s1 = sshll.u32 %s959_s7, 4  ;;  %s801_s27 = smov [#allocation10]   ;;  %s78_s1 = int_to_ptr.hbm [resolvable:$true] %s77_s1 }
   0xd   :  { %60 = dma.hbm_to_vmem [thread:$0]  %s53_s21, 256, %s55_s24, [#allocation6], %s796_s13, %s796_s13, %s797_s14  }
   0xe   :  { %s79_s5 = sshll.u32 %s801_s27, 4  ;;  %s80_s5 = int_to_ptr.vmem [resolvable:$true] %s79_s5 }
   0xf   :  { %82 = dma.hbm_to_vmem [thread:$0]  %s78_s1, 16, %s80_s5, [#allocation9]  }
  0x10   :  { %789 = dma.done.wait [#allocation4], 192  }
  0x11   :  { %790 = vsyncadd [#allocation4], 4294967104 }
  0x12   :  { %791 = dma.done.wait [#allocation6], 448  }
  0x13   :  { %792 = vsyncadd [#allocation6], 4294966848 }
  0x14   :  { %793 = dma.done.wait [#allocation9], 32  }
  0x15   :  { %794 = vsyncadd [#allocation9], 4294967264  ;;  %v114_v0 = vld [vmem:[%s955_s3 + $0x8] sm:$0xf]  ;;  %v604_v1 = vld [vmem:[%s955_s3] sm:$0xff]  ;;  %s802_s9 = smov 96  }
  0x16   :  { %v134_v2 = vunpack.c.l.b16 %v114_v0  ;;  %188 = vrot.lane.b32.xlu1 %v604_v1, %s802_s9  ;;  %vm145_vm0 = vcmask 1043456   ;;  %v120_v5 = vld [vmem:[%s952_s0 + $0x8] sm:$0xf]  ;;  %vm138_vm1 = vcmask 195584   ;;  %v179_v8 = vld [vmem:[#allocation3 + $0x8] sm:$0xf] }
  0x17   :  { %v126_v6 = vunpack.c.l.b16 %v120_v5  ;;  %v185_v12 = vunpack.c.l.b16 %v179_v8  ;;  %v605_v13 = vld [vmem:[%s952_s0] sm:$0xff]  ;;  %vm108_vm2 = vcmask 785408   ;;  %v803_v14 = vmov 0.0   ;;  %v606_v15 = vld [vmem:[#allocation3] sm:$0xff]  ;;  %v244_v21 = vld [vmem:[#allocation5 + $0x8] sm:$0xf] }
  0x18   :  { %v136_v3 = vpack.c.b16 %v134_v2, %v134_v2  ;;  %111 = vst.msk [vmem:[#allocation2 + $0x10] sm:$0xff] %vm108_vm2, %v803_v14  ;;  %v607_v20 = vld [vmem:[#allocation5] sm:$0xff]  ;;  %v250_v22 = vunpack.c.l.b16 %v244_v21  ;;  %vm170_vm3 = vcmask 261120   ;;  %s804_s0 = smov 32   ;;  %vm235_vm4 = vcmask 523520   ;;  %v609_v51 = vld [vmem:[#allocation7 + $0x8] sm:$0xff] }
  0x19   :  { %v128_v7 = vpack.c.b16 %v126_v6, %v126_v6  ;;  %109 = vst.msk [vmem:[#allocation2] sm:$0xff] %vm108_vm2, %v803_v14  ;;  %v187_v16 = vpack.c.b16 %v185_v12, %v185_v12  ;;  %v608_v52 = vld [vmem:[#allocation7] sm:$0xff]  ;;  %vm300_vm5 = vcmask 785920   ;;  %v624_v59 = vld [vmem:[%s956_s4] ss:$0 sm:$0xff]  ;;  %vm557_vm6 = vcmask 257024  }
  0x1a   :  { %190 = vrot.lane.b32.xlu0 %v136_v3, %s802_s9  ;;  %v147_v4 = vsel %vm145_vm0, %v136_v3, 0  ;;  %110 = vst.msk [vmem:[#allocation2 + $0x8] sm:$0xff] %vm108_vm2, %v803_v14  ;;  %v252_v23 = vpack.c.b16 %v250_v22, %v250_v22 }
  0x1b   :  { %610 = vmatpush.bf16.msra.mxu2 %v147_v4  ;;  %155 = vmatpush.bf16.msra.mxu0 %v147_v4 }
  0x1e   :  { %253 = vrot.lane.b32.xlu1 %v604_v1, %s796_s13 }
  0x1f   :  { %611 = vmatpush.bf16.msra.mxu2 %v604_v1  ;;  %156 = vmatpush.bf16.msra.mxu0 %v604_v1  ;;  %v117_v24 = vld [vmem:[#allocation2 + $0x10] sm:$0xff] }
  0x20   :  { %v115_v37 = vld [vmem:[#allocation2] sm:$0xff] }
  0x21   :  { %v116_v38 = vld [vmem:[#allocation2 + $0x8] sm:$0xff] }
  0x22   :  { %255 = vrot.lane.b32.xlu0 %v136_v3, %s796_s13  ;;  %577 = vmatmul.msk.bf16.vlgmr.msra.gmra.mxu2 %vm138_vm1, %v128_v7 }
  0x23   :  { %576 = vmatmul.msk.bf16.vlgmr.msra.gmra.mxu0 %vm138_vm1, %v605_v13  ;;  %v625_v13 = vld [vmem:[#allocation8] ss:$0 sm:$0xff] }
  0x24   :  { %400 = vmatpush.bf16.msrb.mxu0 %v609_v51 }
  0x28   :  { %401 = vmatpush.bf16.msrb.mxu0 %v608_v52 }
  0x88   :  { %v189_v11 = vpop.permute.xlu1 %188 }
  0x8c   :  { %v191_v9 = vpop.permute.xlu0 %190 }
  0x8d   :  { %v200_v10 = vsel %vm145_vm0, %v191_v9, 0 }
  0x8e   :  { %208 = vmatpush.bf16.msra.mxu1 %v200_v10  ;;  %612 = vmatpush.bf16.msra.mxu3 %v200_v10 }
  0x90   :  { %v254_v19 = vpop.permute.xlu1 %253 }
  0x92   :  { %209 = vmatpush.bf16.msra.mxu1 %v189_v11  ;;  %613 = vmatpush.bf16.msra.mxu3 %v189_v11 }
  0x94   :  { %v256_v17 = vpop.permute.xlu0 %255 }
  0x95   :  { %582 = vmatmul.msk.bf16.vlgmr.msra.gmra.mxu1 %vm138_vm1, %v606_v15  ;;  %v265_v18 = vsel %vm145_vm0, %v256_v17, 0  ;;  %583 = vmatmul.msk.bf16.vlgmr.msra.gmra.mxu3 %vm138_vm1, %v187_v16  ;;  %v626_v17 = vld [vmem:[#allocation10] ss:$0 sm:$0xff] }
  0x96   :  { %273 = vmatpush.bf16.msrb.mxu2 %v265_v18  ;;  %355 = vmatpush.bf16.msrb.mxu3 %v609_v51 }
  0x97   :  { %440 = vmatpush.bf16.msrb.mxu1 %v609_v51 }
  0x9a   :  { %274 = vmatpush.bf16.msrb.mxu2 %v254_v19  ;;  %356 = vmatpush.bf16.msrb.mxu3 %v608_v52 }
  0x9b   :  { %441 = vmatpush.bf16.msrb.mxu1 %v608_v52 }
  0x9d   :  { %588 = vmatmul.msk.bf16.vlgmr.msrb.gmra.mxu2 %vm138_vm1, %v607_v20 }
  0xa0   :  { %v158_v36 = vpop.f32.mrf.mxu0 }
  0xa1   :  { %v167_v40 = vadd.f32 %v158_v36, %v115_v37 }
  0xa3   :  { %171 = vst.msk [vmem:[#allocation2] sm:$0xff] %vm170_vm3, %v167_v40 }
  0xa5   :  { %v163_v25 = vpop.f32.mrf.mxu2 }
  0xa6   :  { %v169_v26 = vadd.f32 %v163_v25, %v117_v24 }
  0xa8   :  { %173 = vst.msk [vmem:[#allocation2 + $0x10] sm:$0xff] %vm170_vm3, %v169_v26  ;;  %v160_v39 = vpop.f32.mrf.mxu0 }
  0xa9   :  { %v168_v41 = vadd.f32 %v160_v39, %v116_v38 }
  0xaa   :  { %v174_v42 = vld [vmem:[#allocation2] sm:$0xff] }
  0xab   :  { %172 = vst.msk [vmem:[#allocation2 + $0x8] sm:$0xff] %vm170_vm3, %v168_v41 }
  0xad   :  { %589 = vmatmul.msk.bf16.gmra.mxu2 %vm138_vm1, %v252_v23  ;;  %v165_v27 = vpop.f32.mrf.mxu2 }
  0xaf   :  { %v176_v49 = vld [vmem:[#allocation2 + $0x10] sm:$0xff] }
  0xb2   :  { %v175_v45 = vld [vmem:[#allocation2 + $0x8] sm:$0xff] }
 0x112   :  { %v211_v28 = vpop.f32.mrf.mxu1 }
 0x113   :  { %223 = vrot.lane.b32.xlu2 %v211_v28, %s804_s0 }
 0x118   :  { %v216_v29 = vpop.f32.mrf.mxu3 }
 0x11a   :  { %v213_v30 = vpop.f32.mrf.mxu1 }
 0x11b   :  { %225 = vrot.lane.b32.xlu2 %v213_v30, %s804_s0 }
 0x120   :  { %v276_v31 = vpop.f32.mrf.mxu2  ;;  %v218_v32 = vpop.f32.mrf.mxu3 }
 0x121   :  { %288 = vrot.lane.b32.xlu0 %v276_v31, %s796_s13 }
 0x123   :  { %227 = vrot.lane.b32.xlu2 %v216_v29, %s804_s0 }
 0x128   :  { %v278_v33 = vpop.f32.mrf.mxu2 }
 0x129   :  { %290 = vrot.lane.b32.xlu1 %v278_v33, %s796_s13 }
 0x130   :  { %v281_v34 = vpop.f32.mrf.mxu2 }
 0x131   :  { %292 = vrot.lane.b32.xlu0 %v281_v34, %s796_s13 }
 0x138   :  { %v283_v35 = vpop.f32.mrf.mxu2 }
 0x16d   :  { %v224_v43 = vpop.permute.xlu2 %223 }
 0x16e   :  { %v232_v44 = vadd.f32 %v224_v43, %v174_v42 }
 0x170   :  { %236 = vst.msk [vmem:[#allocation2] sm:$0xff] %vm235_vm4, %v232_v44 }
 0x175   :  { %v226_v46 = vpop.permute.xlu2 %225 }
 0x176   :  { %v233_v47 = vadd.f32 %v226_v46, %v175_v45 }
 0x177   :  { %v239_v53 = vld [vmem:[#allocation2] sm:$0xff] }
 0x178   :  { %237 = vst.msk [vmem:[#allocation2 + $0x8] sm:$0xff] %vm235_vm4, %v233_v47 }
 0x17d   :  { %v228_v48 = vpop.permute.xlu2 %227 }
 0x17e   :  { %v234_v50 = vadd.f32 %v228_v48, %v176_v49 }
 0x17f   :  { %v240_v57 = vld [vmem:[#allocation2 + $0x8] sm:$0xff] }
 0x180   :  { %238 = vst.msk [vmem:[#allocation2 + $0x10] sm:$0xff] %vm235_vm4, %v234_v50 }
 0x187   :  { %v241_v62 = vld [vmem:[#allocation2 + $0x10] sm:$0xff] }
 0x193   :  { %v289_v54 = vpop.permute.xlu0 %288 }
 0x194   :  { %v297_v55 = vadd.f32 %v289_v54, %v239_v53 }
 0x196   :  { %301 = vst.msk [vmem:[#allocation2] sm:$0xff] %vm300_vm5, %v297_v55 }
 0x19b   :  { %v291_v56 = vpop.permute.xlu1 %290 }
 0x19c   :  { %v298_v58 = vadd.f32 %v291_v56, %v240_v57 }
 0x19d   :  { %v307_v60 = vld [vmem:[#allocation2] sm:$0xff] }
 0x19e   :  { %302 = vst.msk [vmem:[#allocation2 + $0x8] sm:$0xff] %vm300_vm5, %v298_v58  ;;  %v314_v0 = vadd.f32 %v624_v59, %v307_v60 }
 0x1a0   :  { %v905_v3 = vmax.f32 %v314_v0, 0.0 }
 0x1a3   :  { %v293_v61 = vpop.permute.xlu0 %292 }
 0x1a4   :  { %v299_v63 = vadd.f32 %v293_v61, %v241_v62 }
 0x1a5   :  { %v308_v1 = vld [vmem:[#allocation2 + $0x8] sm:$0xff] }
 0x1a6   :  { %303 = vst.msk [vmem:[#allocation2 + $0x10] sm:$0xff] %vm300_vm5, %v299_v63  ;;  %v315_v2 = vadd.f32 %v624_v59, %v308_v1 }
 0x1a8   :  { %v907_v4 = vmax.f32 %v315_v2, 0.0 }
 0x1aa   :  { %v326_v5 = vpack.c.bf16 %v907_v4, %v905_v3 }
 0x1ac   :  { %424 = vrot.lane.b32.xlu2 %v326_v5, %s796_s13  ;;  %384 = vrot.lane.b32.xlu1 %v326_v5, %s802_s9 }
 0x1ad   :  { %598 = vmatmul.msk.bf16.vlgmr.msrb.gmra.mxu3 %vm170_vm3, %v326_v5  ;;  %v309_v6 = vld [vmem:[#allocation2 + $0x10] sm:$0xff] }
 0x1ae   :  { %v316_v7 = vadd.f32 %v624_v59, %v309_v6 }
 0x1b0   :  { %v914_v8 = vmax.f32 %v316_v7, 0.0 }
 0x1b2   :  { %v327_v9 = vpack.c.bf16 %v914_v8, %v914_v8 }
 0x1b4   :  { %386 = vrot.lane.b32.xlu0 %v327_v9, %s802_s9  ;;  %426 = vrot.lane.b32.xlu1 %v327_v9, %s796_s13 }
 0x1bd   :  { %599 = vmatmul.msk.bf16.gmra.mxu3 %vm170_vm3, %v327_v9 }
 0x206   :  { %v425_v10 = vpop.permute.xlu2 %424 }
 0x207   :  { %602 = vmatmul.msk.bf16.vlgmr.msrb.gmra.mxu1 %vm170_vm3, %v425_v10 }
 0x21e   :  { %v385_v11 = vpop.permute.xlu1 %384 }
 0x21f   :  { %600 = vmatmul.msk.bf16.vlgmr.msrb.gmra.mxu0 %vm170_vm3, %v385_v11 }
 0x226   :  { %v427_v12 = vpop.permute.xlu1 %426  ;;  %v387_v14 = vpop.permute.xlu0 %386 }
 0x227   :  { %603 = vmatmul.msk.bf16.gmra.mxu1 %vm170_vm3, %v427_v12 }
 0x22f   :  { %601 = vmatmul.msk.bf16.gmra.mxu0 %vm170_vm3, %v387_v14 }
 0x230   :  { %v358_v15 = vpop.f32.mrf.mxu3 }
 0x231   :  { %v359_v16 = vadd.f32 %v625_v13, %v358_v15 }
 0x233   :  { %627 = vtanh.f32 %v359_v16 }
 0x238   :  { %v360_v18 = vpop.f32.mrf.mxu3 }
 0x239   :  { %v628_v19 = vpop.eup %627  ;;  %v361_v20 = vadd.f32 %v625_v13, %v360_v18 }
 0x23a   :  { %v373_v21 = vmul.f32 %v628_v19, %v626_v17 }
 0x23b   :  { %629 = vtanh.f32 %v361_v20 }
 0x23c   :  { %376 = vadd.xlane.f32.xlu2 %v373_v21 }
 0x240   :  { %v363_v22 = vpop.f32.mrf.mxu3 }
 0x241   :  { %v630_v23 = vpop.eup %629  ;;  %v364_v24 = vadd.f32 %v625_v13, %v363_v22 }
 0x242   :  { %v374_v25 = vmul.f32 %v630_v23, %v626_v17 }
 0x243   :  { %631 = vtanh.f32 %v364_v24 }
 0x244   :  { %378 = vadd.xlane.f32.xlu0 %v374_v25 }
 0x248   :  { %v365_v26 = vpop.f32.mrf.mxu3 }
 0x249   :  { %v632_v27 = vpop.eup %631 }
 0x24a   :  { %v375_v28 = vmul.f32 %v632_v27, %v626_v17 }
 0x24c   :  { %380 = vadd.xlane.f32.xlu1 %v375_v28 }
 0x284   :  { %v443_v29 = vpop.f32.mrf.mxu1 }
 0x285   :  { %v444_v30 = vadd.f32 %v625_v13, %v443_v29 }
 0x287   :  { %633 = vtanh.f32 %v444_v30 }
 0x28c   :  { %v445_v33 = vpop.f32.mrf.mxu1 }
 0x28d   :  { %v634_v31 = vpop.eup %633  ;;  %v446_v41 = vadd.f32 %v625_v13, %v445_v33 }
 0x28e   :  { %v455_v32 = vmul.f32 %v634_v31, %v626_v17 }
 0x290   :  { %458 = vadd.xlane.f32.xlu1 %v455_v32 }
 0x29c   :  { %v403_v34 = vpop.f32.mrf.mxu0 }
 0x29d   :  { %v404_v35 = vadd.f32 %v625_v13, %v403_v34 }
 0x29f   :  { %635 = vtanh.f32 %v404_v35 }
 0x2a4   :  { %v405_v36 = vpop.f32.mrf.mxu0  ;;  %v448_v37 = vpop.f32.mrf.mxu1 }
 0x2a5   :  { %v636_v38 = vpop.eup %635  ;;  %v406_v39 = vadd.f32 %v625_v13, %v405_v36  ;;  %v449_v47 = vadd.f32 %v625_v13, %v448_v37 }
 0x2a6   :  { %v415_v40 = vmul.f32 %v636_v38, %v626_v17 }
 0x2a7   :  { %637 = vtanh.f32 %v406_v39 }
 0x2a8   :  { %418 = vadd.xlane.f32.xlu2 %v415_v40  ;;  %639 = vtanh.f32 %v446_v41 }
 0x2ac   :  { %v408_v42 = vpop.f32.mrf.mxu0  ;;  %v450_v43 = vpop.f32.mrf.mxu1 }
 0x2ad   :  { %v638_v44 = vpop.eup %637  ;;  %v409_v45 = vadd.f32 %v625_v13, %v408_v42 }
 0x2ae   :  { %v416_v46 = vmul.f32 %v638_v44, %v626_v17  ;;  %v640_v48 = vpop.eup %639 }
 0x2af   :  { %641 = vtanh.f32 %v409_v45  ;;  %v456_v52 = vmul.f32 %v640_v48, %v626_v17  ;;  %v377_v55 = vpop.xlane.xlu2 %376 }
 0x2b0   :  { %420 = vadd.xlane.f32.xlu2 %v416_v46  ;;  %643 = vtanh.f32 %v449_v47 }
 0x2b4   :  { %v410_v49 = vpop.f32.mrf.mxu0 }
 0x2b5   :  { %v642_v50 = vpop.eup %641 }
 0x2b6   :  { %v417_v51 = vmul.f32 %v642_v50, %v626_v17  ;;  %v644_v53 = vpop.eup %643 }
 0x2b7   :  { %v457_v54 = vmul.f32 %v644_v53, %v626_v17  ;;  %v379_v2 = vpop.xlane.xlu0 %378 }
 0x2b8   :  { %422 = vadd.xlane.f32.xlu0 %v417_v51  ;;  %460 = vadd.xlane.f32.xlu2 %v456_v52 }
 0x2bf   :  { %v381_v56 = vpop.xlane.xlu1 %380 }
 0x2c0   :  { %462 = vadd.xlane.f32.xlu0 %v457_v54 }
 0x303   :  { %v459_v59 = vpop.xlane.xlu1 %458 }
 0x31b   :  { %v419_v57 = vpop.xlane.xlu2 %418 }
 0x31c   :  { %v464_v58 = vmax.f32 %v377_v55, %v419_v57 }
 0x31e   :  { %v467_v60 = vmax.f32 %v464_v58, %v459_v59 }
 0x320   :  { %v470_v61 = vsub.f32 %v377_v55, %v467_v60  ;;  %v479_v62 = vsub.f32 %v419_v57, %v467_v60  ;;  %v488_v63 = vsub.f32 %v459_v59, %v467_v60 }
 0x322   :  { %v473_v0 = vmul.f32 1.442695, %v470_v61  ;;  %v482_v1 = vmul.f32 1.442695, %v479_v62  ;;  %v491_v5 = vmul.f32 1.442695, %v488_v63 }
 0x323   :  { %v421_v6 = vpop.xlane.xlu2 %420 }
 0x324   :  { %645 = vpow2.f32 %v473_v0  ;;  %v465_v9 = vmax.f32 %v379_v2, %v421_v6 }
 0x325   :  { %647 = vpow2.f32 %v482_v1 }
 0x326   :  { %649 = vpow2.f32 %v491_v5 }
 0x32a   :  { %v646_v7 = vpop.eup %645 }
 0x32b   :  { %v648_v10 = vpop.eup %647  ;;  %v423_v11 = vpop.xlane.xlu0 %422 }
 0x32c   :  { %v461_v12 = vpop.xlane.xlu2 %460  ;;  %v497_v13 = vadd.f32 %v648_v10, %v646_v7  ;;  %v650_v15 = vpop.eup %649  ;;  %v466_v23 = vmax.f32 %v381_v56, %v423_v11 }
 0x32d   :  { %v468_v14 = vmax.f32 %v465_v9, %v461_v12 }
 0x32e   :  { %v500_v16 = vadd.f32 %v650_v15, %v497_v13 }
 0x32f   :  { %v471_v17 = vsub.f32 %v379_v2, %v468_v14  ;;  %v480_v18 = vsub.f32 %v421_v6, %v468_v14  ;;  %v489_v19 = vsub.f32 %v461_v12, %v468_v14 }
 0x330   :  { %651 = vrcp.f32 %v500_v16 }
 0x331   :  { %v475_v20 = vmul.f32 1.442695, %v471_v17  ;;  %v484_v21 = vmul.f32 1.442695, %v480_v18  ;;  %v493_v22 = vmul.f32 1.442695, %v489_v19 }
 0x333   :  { %653 = vpow2.f32 %v475_v20  ;;  %v463_v24 = vpop.xlane.xlu0 %462 }
 0x334   :  { %655 = vpow2.f32 %v484_v21  ;;  %v469_v25 = vmax.f32 %v466_v23, %v463_v24 }
 0x335   :  { %657 = vpow2.f32 %v493_v22 }
 0x336   :  { %v652_v26 = vpop.eup %651  ;;  %v472_v27 = vsub.f32 %v381_v56, %v469_v25  ;;  %v481_v28 = vsub.f32 %v423_v11, %v469_v25  ;;  %v490_v29 = vsub.f32 %v463_v24, %v469_v25 }
 0x337   :  { %v512_v30 = vmul.f32 %v652_v26, %v648_v10  ;;  %v506_v31 = vmul.f32 %v652_v26, %v646_v7  ;;  %v533_v41 = vmul.f32 %v652_v26, %v650_v15 }
 0x338   :  { %v477_v33 = vmul.f32 1.442695, %v472_v27  ;;  %v486_v34 = vmul.f32 1.442695, %v481_v28  ;;  %v495_v36 = vmul.f32 1.442695, %v490_v29 }
 0x339   :  { %v654_v32 = vpop.eup %653  ;;  %v515_v37 = vmul.f32 %v512_v30, %v905_v3  ;;  %v536_v44 = vmul.f32 %v533_v41, %v905_v3  ;;  %v509_v61 = vmul.f32 %v506_v31, %v905_v3 }
 0x33a   :  { %v656_v35 = vpop.eup %655  ;;  %659 = vpow2.f32 %v477_v33 }
 0x33b   :  { %v498_v38 = vadd.f32 %v656_v35, %v654_v32  ;;  %v658_v39 = vpop.eup %657  ;;  %661 = vpow2.f32 %v486_v34  ;;  %521 = vrot.lane.b32.xlu1 %v515_v37, %s802_s9 }
 0x33c   :  { %663 = vpow2.f32 %v495_v36 }
 0x33d   :  { %v501_v40 = vadd.f32 %v658_v39, %v498_v38 }
 0x33f   :  { %665 = vrcp.f32 %v501_v40 }
 0x340   :  { %v660_v42 = vpop.eup %659 }
 0x341   :  { %v662_v43 = vpop.eup %661 }
 0x342   :  { %v499_v45 = vadd.f32 %v662_v43, %v660_v42  ;;  %v664_v46 = vpop.eup %663 }
 0x343   :  { %542 = vrot.lane.b32.xlu1 %v536_v44, %s796_s13 }
 0x344   :  { %v502_v48 = vadd.f32 %v664_v46, %v499_v45 }
 0x345   :  { %v666_v47 = vpop.eup %665 }
 0x346   :  { %v513_v49 = vmul.f32 %v666_v47, %v656_v35  ;;  %v507_v50 = vmul.f32 %v666_v47, %v654_v32  ;;  %667 = vrcp.f32 %v502_v48  ;;  %v534_v58 = vmul.f32 %v666_v47, %v658_v39 }
 0x348   :  { %v516_v51 = vmul.f32 %v513_v49, %v907_v4  ;;  %v537_v59 = vmul.f32 %v534_v58, %v907_v4  ;;  %v510_v11 = vmul.f32 %v507_v50, %v907_v4 }
 0x34a   :  { %523 = vrot.lane.b32.xlu2 %v516_v51, %s802_s9 }
 0x34c   :  { %v668_v52 = vpop.eup %667 }
 0x34d   :  { %v514_v53 = vmul.f32 %v668_v52, %v662_v43  ;;  %v535_v54 = vmul.f32 %v668_v52, %v664_v46  ;;  %v508_v55 = vmul.f32 %v668_v52, %v660_v42 }
 0x34f   :  { %v517_v56 = vmul.f32 %v514_v53, %v914_v8  ;;  %v538_v57 = vmul.f32 %v535_v54, %v914_v8  ;;  %v511_v5 = vmul.f32 %v508_v55, %v914_v8 }
 0x351   :  { %525 = vrot.lane.b32.xlu0 %v517_v56, %s802_s9 }
 0x352   :  { %546 = vrot.lane.b32.xlu2 %v538_v57, %s796_s13 }
 0x359   :  { %544 = vrot.lane.b32.xlu0 %v537_v59, %s796_s13 }
 0x3a4   :  { %v524_v2 = vpop.permute.xlu2 %523 }
 0x3a5   :  { %v531_v12 = vadd.f32 %v524_v2, %v510_v11 }
 0x3ac   :  { %v547_v9 = vpop.permute.xlu2 %546 }
 0x3ad   :  { %v522_v60 = vpop.permute.xlu1 %521 }
 0x3ae   :  { %v530_v62 = vadd.f32 %v522_v60, %v509_v61 }
 0x3b5   :  { %v543_v63 = vpop.permute.xlu1 %542 }
 0x3b6   :  { %v551_v0 = vadd.f32 %v543_v63, %v530_v62 }
 0x3b8   :  { %v554_v1 = vpack.c.bf16 %v551_v0, %v551_v0 }
 0x3ba   :  { %558 = vst.msk [vmem:[%s960_s8] sm:$0xf] %vm557_vm6, %v554_v1 }
 0x3c3   :  { %v526_v6 = vpop.permute.xlu0 %525 }
 0x3c4   :  { %v532_v7 = vadd.f32 %v526_v6, %v511_v5 }
 0x3c6   :  { %v553_v10 = vadd.f32 %v547_v9, %v532_v7 }
 0x3c8   :  { %v556_v3 = vpack.c.bf16 %v553_v10, %v553_v10 }
 0x3ca   :  { %560 = vst.msk [vmem:[%s960_s8 + $0x8] sm:$0xf] %vm557_vm6, %v556_v3 }
 0x3cb   :  { %v545_v13 = vpop.permute.xlu0 %544 }
 0x3cc   :  { %v552_v14 = vadd.f32 %v545_v13, %v531_v12 }
 0x3ce   :  { %v555_v15 = vpack.c.bf16 %v552_v14, %v552_v14 }
 0x3d0   :  { %559 = vst.msk [vmem:[%s960_s8 + $0x4] sm:$0xf] %vm557_vm6, %v555_v15 }
 0x3d1   :  { %565 = vsyncpa [#allocation4], 1 }
 0x3d2   :  { %566 = vsyncpa [#allocation6], 1 }
 0x3d3   :  { %567 = vsyncpa [#allocation9], 1 }

// kernel: mgcna_forward.8
= control target key start
LH: loop header
LB: loop body
LE: loop exit
PB: predicated region body
PF: predicated region fallthrough
CT: control target
= control target key end

     0   :  { %10 = vsyncpa [#allocation4], 0  ;;  %s464_s0 = inlined_call_operand.hbm [shape: bf16[16,16], index: 0, kind: input, shape index: {}]   ;;  %s465_s1 = inlined_call_operand.hbm [shape: bf16[16,16], index: 1, kind: input, shape index: {}]   ;;  %s466_s2 = inlined_call_operand.vmem [shape: bf16[16,64], index: 2, kind: input, shape index: {}]   ;;  %s467_s3 = inlined_call_operand.vmem [shape: f32[1,64], index: 3, kind: input, shape index: {}]   ;;  %s468_s4 = inlined_call_operand.hbm [shape: bf16[2,32,32], index: 4, kind: input, shape index: {}]   ;;  %s469_s5 = inlined_call_operand.vmem [shape: bf16[16,64], index: 5, kind: output, shape index: {}]  }
   0x1   :  { %11 = vsyncpa [#allocation6], 0  ;;  %s29_s20 = sshll.u32 %s465_s1, 4  ;;  %s389_s21 = smov [#allocation5]   ;;  %s30_s20 = int_to_ptr.hbm [resolvable:$true] %s29_s20 }
   0x2   :  { %s31_s22 = sshll.u32 %s389_s21, 4  ;;  %s16_s25 = sshll.u32 %s464_s0, 4  ;;  %s32_s22 = int_to_ptr.vmem [resolvable:$true] %s31_s22  ;;  %s17_s25 = int_to_ptr.hbm [resolvable:$true] %s16_s25 }
   0x3   :  { %s390_s26 = smov 64   ;;  %s391_s27 = smov 4  }
   0x4   :  { %37 = dma.hbm_to_vmem [thread:$0]  %s30_s20, 128, %s32_s22, [#allocation6], %s390_s26, %s390_s26, %s391_s27  }
   0x5   :  { %s392_s28 = smov [#allocation3]   ;;  %s46_s7 = sshll.u32 %s468_s4, 4  ;;  %s47_s7 = int_to_ptr.hbm [resolvable:$true] %s46_s7 }
   0x6   :  { %s18_s29 = sshll.u32 %s392_s28, 4  ;;  %s393_s1 = smov [#allocation7]   ;;  %s19_s29 = int_to_ptr.vmem [resolvable:$true] %s18_s29 }
   0x7   :  { %24 = dma.hbm_to_vmem [thread:$0]  %s17_s25, 128, %s19_s29, [#allocation4], %s390_s26, %s390_s26, %s391_s27  }
   0x8   :  { %s48_s8 = sshll.u32 %s393_s1, 4  ;;  %s49_s8 = int_to_ptr.vmem [resolvable:$true] %s48_s8 }
   0x9   :  { %54 = dma.hbm_to_vmem [thread:$0]  %s47_s7, 512, %s49_s8, [#allocation6], %s390_s26, %s390_s26, %s391_s27  }
   0xa   :  { %385 = dma.done.wait [#allocation4], 128  }
   0xb   :  { %386 = vsyncadd [#allocation4], 4294967168 }
   0xc   :  { %387 = dma.done.wait [#allocation6], 640  }
   0xd   :  { %388 = vsyncadd [#allocation6], 4294966656  ;;  %v297_v0 = vld [vmem:[%s466_s2] sm:$0xff]  ;;  %s394_s10 = smov 96   ;;  %v298_v1 = vld [vmem:[#allocation3] sm:$0xff]  ;;  %vm92_vm0 = vcmask 130048  }
   0xe   :  { %124 = vrot.lane.b32.xlu0 %v297_v0, %s394_s10  ;;  %103 = vmatpush.bf16.msra.mxu0 %v297_v0  ;;  %v299_v3 = vld [vmem:[#allocation5] sm:$0xff]  ;;  %vm72_vm1 = vcmask 523264   ;;  %v395_v5 = vmov 0.0   ;;  %vm112_vm2 = vcmask 261120   ;;  %s396_s2 = smov 32   ;;  %v301_v13 = vld [vmem:[#allocation7 + $0x8] sm:$0xff] }
   0xf   :  { %73 = vst.msk [vmem:[#allocation2] sm:$0xff] %vm72_vm1, %v395_v5  ;;  %196 = vmatpush.bf16.msra.mxu2 %v301_v13  ;;  %v300_v14 = vld [vmem:[#allocation7] sm:$0xff]  ;;  %v303_v15 = vld [vmem:[#allocation7 + $0x18] sm:$0xff]  ;;  %v302_v16 = vld [vmem:[#allocation7 + $0x10] sm:$0xff]  ;;  %vm154_vm3 = vcmask 523520   ;;  %vm206_vm4 = vcmask 257024  }
  0x10   :  { %74 = vst.msk [vmem:[#allocation2 + $0x8] sm:$0xff] %vm72_vm1, %v395_v5  ;;  %238 = vmatpush.bf16.msra.mxu3 %v303_v15  ;;  %v312_v23 = vld [vmem:[%s467_s3] ss:$0 sm:$0xff]  ;;  %vm256_vm5 = vcmask 519424  }
  0x11   :  { %273 = vmatmul.msk.bf16.vlgmr.msra.gmra.mxu0 %vm92_vm0, %v298_v1 }
  0x13   :  { %197 = vmatpush.bf16.msra.mxu2 %v300_v14 }
  0x14   :  { %239 = vmatpush.bf16.msra.mxu3 %v302_v16 }
  0x16   :  { %v77_v6 = vld [vmem:[#allocation2] sm:$0xff] }
  0x17   :  { %v78_v9 = vld [vmem:[#allocation2 + $0x8] sm:$0xff] }
  0x80   :  { %v125_v2 = vpop.permute.xlu0 %124 }
  0x81   :  { %137 = vmatpush.bf16.msra.mxu1 %v125_v2 }
  0x84   :  { %278 = vmatmul.msk.bf16.vlgmr.msra.gmra.mxu1 %vm92_vm0, %v299_v3 }
  0x8e   :  { %v105_v4 = vpop.f32.mrf.mxu0 }
  0x8f   :  { %v110_v8 = vadd.f32 %v105_v4, %v77_v6 }
  0x91   :  { %113 = vst.msk [vmem:[#allocation2] sm:$0xff] %vm112_vm2, %v110_v8 }
  0x96   :  { %v107_v7 = vpop.f32.mrf.mxu0 }
  0x97   :  { %v111_v10 = vadd.f32 %v107_v7, %v78_v9 }
  0x98   :  { %v115_v17 = vld [vmem:[#allocation2] sm:$0xff] }
  0x99   :  { %114 = vst.msk [vmem:[#allocation2 + $0x8] sm:$0xff] %vm112_vm2, %v111_v10 }
  0xa0   :  { %v116_v21 = vld [vmem:[#allocation2 + $0x8] sm:$0xff] }
 0x101   :  { %v139_v11 = vpop.f32.mrf.mxu1 }
 0x102   :  { %146 = vrot.lane.b32.xlu0 %v139_v11, %s396_s2 }
 0x109   :  { %v141_v12 = vpop.f32.mrf.mxu1 }
 0x10a   :  { %148 = vrot.lane.b32.xlu1 %v141_v12, %s396_s2 }
 0x174   :  { %v147_v18 = vpop.permute.xlu0 %146 }
 0x175   :  { %v152_v19 = vadd.f32 %v147_v18, %v115_v17 }
 0x177   :  { %155 = vst.msk [vmem:[#allocation2] sm:$0xff] %vm154_vm3, %v152_v19 }
 0x17c   :  { %v149_v20 = vpop.permute.xlu1 %148 }
 0x17d   :  { %v153_v22 = vadd.f32 %v149_v20, %v116_v21 }
 0x17e   :  { %v160_v24 = vld [vmem:[#allocation2] sm:$0xff] }
 0x17f   :  { %156 = vst.msk [vmem:[#allocation2 + $0x8] sm:$0xff] %vm154_vm3, %v153_v22  ;;  %v166_v25 = vadd.f32 %v312_v23, %v160_v24 }
 0x181   :  { %v168_v28 = vmax.f32 %v166_v25, 0.0 }
 0x186   :  { %v161_v26 = vld [vmem:[#allocation2 + $0x8] sm:$0xff] }
 0x187   :  { %v167_v27 = vadd.f32 %v312_v23, %v161_v26 }
 0x189   :  { %v169_v29 = vmax.f32 %v167_v27, 0.0 }
 0x18b   :  { %v170_v30 = vpack.c.bf16 %v169_v29, %v168_v28 }
 0x18d   :  { %215 = vrot.lane.b32.xlu1 %v170_v30, %s394_s10  ;;  %287 = vmatmul.msk.bf16.vlgmr.msra.gmra.mxu2 %vm112_vm2, %v170_v30 }
 0x1ff   :  { %v216_v31 = vpop.permute.xlu1 %215 }
 0x200   :  { %296 = vmatmul.msk.bf16.vlgmr.msra.gmra.mxu3 %vm112_vm2, %v216_v31 }
 0x210   :  { %v199_v32 = vpop.f32.mrf.mxu2 }
 0x211   :  { %v204_v33 = vpack.c.bf16 %v199_v32, %v199_v32 }
 0x213   :  { %207 = vst.msk [vmem:[%s469_s5] sm:$0xf] %vm206_vm4, %v204_v33 }
 0x218   :  { %v201_v34 = vpop.f32.mrf.mxu2 }
 0x219   :  { %v205_v35 = vpack.c.bf16 %v201_v34, %v201_v34 }
 0x21b   :  { %208 = vst.msk [vmem:[%s469_s5 + $0x4] sm:$0xf] %vm206_vm4, %v205_v35 }
 0x283   :  { %v241_v36 = vpop.f32.mrf.mxu3 }
 0x284   :  { %v246_v37 = vpack.c.bf16 %v241_v36, %v241_v36 }
 0x286   :  { %250 = vrot.lane.b32.xlu2 %v246_v37, %s396_s2 }
 0x28b   :  { %v243_v38 = vpop.f32.mrf.mxu3 }
 0x28c   :  { %v247_v39 = vpack.c.bf16 %v243_v38, %v243_v38 }
 0x28e   :  { %252 = vrot.lane.b32.xlu2 %v247_v39, %s396_s2 }
 0x2e0   :  { %v251_v40 = vpop.permute.xlu2 %250 }
 0x2e1   :  { %257 = vst.msk [vmem:[%s469_s5] sm:$0xf] %vm256_vm5, %v251_v40 }
 0x2e8   :  { %v253_v41 = vpop.permute.xlu2 %252 }
 0x2e9   :  { %258 = vst.msk [vmem:[%s469_s5 + $0x4] sm:$0xf] %vm256_vm5, %v253_v41 }
 0x2ea   :  { %263 = vsyncpa [#allocation4], 1 }
 0x2eb   :  { %264 = vsyncpa [#allocation6], 1 }

// kernel: mgcna_forward.9
= control target key start
LH: loop header
LB: loop body
LE: loop exit
PB: predicated region body
PF: predicated region fallthrough
CT: control target
= control target key end

     0   :  { %12 = vsyncpa [#allocation4], 0  ;;  %s573_s0 = inlined_call_operand.hbm [shape: bf16[16,16], index: 0, kind: input, shape index: {}]   ;;  %s574_s1 = inlined_call_operand.hbm [shape: bf16[16,16], index: 1, kind: input, shape index: {}]   ;;  %s575_s2 = inlined_call_operand.vmem [shape: bf16[16,64], index: 2, kind: input, shape index: {}]   ;;  %s576_s3 = inlined_call_operand.vmem [shape: f32[1,64], index: 3, kind: input, shape index: {}]   ;;  %s577_s4 = inlined_call_operand.hbm [shape: bf16[32,128], index: 4, kind: input, shape index: {}]   ;;  %s578_s5 = inlined_call_operand.vmem [shape: f32[1,128], index: 5, kind: input, shape index: {}]   ;;  %s579_s6 = inlined_call_operand.hbm [shape: f32[1,128], index: 6, kind: input, shape index: {}]   ;;  %s580_s7 = inlined_call_operand.vmem [shape: bf16[16,32], index: 7, kind: output, shape index: {}]  }
   0x1   :  { %13 = vsyncpa [#allocation6], 0 }
   0x2   :  { %14 = vsyncpa [#allocation9], 0  ;;  %s32_s26 = sshll.u32 %s574_s1, 4  ;;  %s479_s27 = smov [#allocation5]   ;;  %s33_s26 = int_to_ptr.hbm [resolvable:$true] %s32_s26 }
   0x3   :  { %s34_s28 = sshll.u32 %s479_s27, 4  ;;  %s19_s8 = sshll.u32 %s573_s0, 4  ;;  %s35_s28 = int_to_ptr.vmem [resolvable:$true] %s34_s28  ;;  %s20_s8 = int_to_ptr.hbm [resolvable:$true] %s19_s8 }
   0x4   :  { %s480_s9 = smov 64   ;;  %s481_s10 = smov 4  }
   0x5   :  { %40 = dma.hbm_to_vmem [thread:$0]  %s33_s26, 128, %s35_s28, [#allocation6], %s480_s9, %s480_s9, %s481_s10  }
   0x6   :  { %s482_s11 = smov [#allocation3]   ;;  %s49_s15 = sshll.u32 %s577_s4, 4  ;;  %s50_s15 = int_to_ptr.hbm [resolvable:$true] %s49_s15 }
   0x7   :  { %s21_s12 = sshll.u32 %s482_s11, 4  ;;  %s65_s17 = sshll.u32 %s579_s6, 4  ;;  %s22_s12 = int_to_ptr.vmem [resolvable:$true] %s21_s12  ;;  %s66_s17 = int_to_ptr.hbm [resolvable:$true] %s65_s17 }
   0x8   :  { %27 = dma.hbm_to_vmem [thread:$0]  %s20_s8, 128, %s22_s12, [#allocation4], %s480_s9, %s480_s9, %s481_s10  }
   0x9   :  { %s483_s18 = smov [#allocation7]   ;;  %s484_s0 = smov [#allocation8]  }
   0xa   :  { %s51_s19 = sshll.u32 %s483_s18, 4  ;;  %s67_s20 = sshll.u32 %s484_s0, 4  ;;  %s52_s19 = int_to_ptr.vmem [resolvable:$true] %s51_s19  ;;  %s68_s20 = int_to_ptr.vmem [resolvable:$true] %s67_s20 }
   0xb   :  { %57 = dma.hbm_to_vmem [thread:$0]  %s50_s15, 256, %s52_s19, [#allocation6], %s480_s9, %s480_s9, %s481_s10  }
   0xc   :  { %70 = dma.hbm_to_vmem [thread:$0]  %s66_s17, 16, %s68_s20, [#allocation9]  }
   0xd   :  { %473 = dma.done.wait [#allocation4], 128  }
   0xe   :  { %474 = vsyncadd [#allocation4], 4294967168 }
   0xf   :  { %475 = dma.done.wait [#allocation6], 384  }
  0x10   :  { %476 = vsyncadd [#allocation6], 4294966912 }
  0x11   :  { %477 = dma.done.wait [#allocation9], 16  }
  0x12   :  { %478 = vsyncadd [#allocation9], 4294967280  ;;  %v340_v0 = vld [vmem:[%s575_s2] sm:$0xff]  ;;  %s485_s6 = smov 96   ;;  %v341_v1 = vld [vmem:[#allocation3] sm:$0xff]  ;;  %vm112_vm0 = vcmask 130048  }
  0x13   :  { %144 = vrot.lane.b32.xlu0 %v340_v0, %s485_s6  ;;  %123 = vmatpush.bf16.msra.mxu0 %v340_v0  ;;  %v342_v3 = vld [vmem:[#allocation5] sm:$0xff]  ;;  %vm92_vm1 = vcmask 523264   ;;  %v486_v5 = vmov 0.0   ;;  %vm132_vm2 = vcmask 261120   ;;  %s487_s2 = smov 32   ;;  %v344_v13 = vld [vmem:[#allocation7 + $0x8] sm:$0xff] }
  0x14   :  { %93 = vst.msk [vmem:[#allocation2] sm:$0xff] %vm92_vm1, %v486_v5  ;;  %221 = vmatpush.bf16.msra.mxu2 %v344_v13  ;;  %v343_v14 = vld [vmem:[#allocation7] sm:$0xff]  ;;  %252 = vmatpush.bf16.msra.mxu3 %v344_v13  ;;  %vm174_vm3 = vcmask 523520   ;;  %v356_v33 = vld [vmem:[#allocation8] ss:$0 sm:$0xff]  ;;  %vm306_vm4 = vcmask 257024  }
  0x15   :  { %94 = vst.msk [vmem:[#allocation2 + $0x8] sm:$0xff] %vm92_vm1, %v486_v5  ;;  %v354_v21 = vld [vmem:[%s576_s3] ss:$0 sm:$0xff] }
  0x16   :  { %324 = vmatmul.msk.bf16.vlgmr.msra.gmra.mxu0 %vm112_vm0, %v341_v1  ;;  %v355_v30 = vld [vmem:[%s578_s5] ss:$0 sm:$0xff] }
  0x18   :  { %222 = vmatpush.bf16.msra.mxu2 %v343_v14  ;;  %253 = vmatpush.bf16.msra.mxu3 %v343_v14 }
  0x1b   :  { %v97_v6 = vld [vmem:[#allocation2] sm:$0xff] }
  0x1c   :  { %v98_v9 = vld [vmem:[#allocation2 + $0x8] sm:$0xff] }
  0x85   :  { %v145_v2 = vpop.permute.xlu0 %144 }
  0x86   :  { %157 = vmatpush.bf16.msra.mxu1 %v145_v2 }
  0x89   :  { %329 = vmatmul.msk.bf16.vlgmr.msra.gmra.mxu1 %vm112_vm0, %v342_v3 }
  0x93   :  { %v125_v4 = vpop.f32.mrf.mxu0 }
  0x94   :  { %v130_v8 = vadd.f32 %v125_v4, %v97_v6 }
  0x96   :  { %133 = vst.msk [vmem:[#allocation2] sm:$0xff] %vm132_vm2, %v130_v8 }
  0x9b   :  { %v127_v7 = vpop.f32.mrf.mxu0 }
  0x9c   :  { %v131_v10 = vadd.f32 %v127_v7, %v98_v9 }
  0x9d   :  { %v135_v15 = vld [vmem:[#allocation2] sm:$0xff] }
  0x9e   :  { %134 = vst.msk [vmem:[#allocation2 + $0x8] sm:$0xff] %vm132_vm2, %v131_v10 }
  0xa5   :  { %v136_v19 = vld [vmem:[#allocation2 + $0x8] sm:$0xff] }
 0x106   :  { %v159_v11 = vpop.f32.mrf.mxu1 }
 0x107   :  { %166 = vrot.lane.b32.xlu0 %v159_v11, %s487_s2 }
 0x10e   :  { %v161_v12 = vpop.f32.mrf.mxu1 }
 0x10f   :  { %168 = vrot.lane.b32.xlu1 %v161_v12, %s487_s2 }
 0x179   :  { %v167_v16 = vpop.permute.xlu0 %166 }
 0x17a   :  { %v172_v17 = vadd.f32 %v167_v16, %v135_v15 }
 0x17c   :  { %175 = vst.msk [vmem:[#allocation2] sm:$0xff] %vm174_vm3, %v172_v17 }
 0x181   :  { %v169_v18 = vpop.permute.xlu1 %168 }
 0x182   :  { %v173_v20 = vadd.f32 %v169_v18, %v136_v19 }
 0x183   :  { %v180_v22 = vld [vmem:[#allocation2] sm:$0xff] }
 0x184   :  { %176 = vst.msk [vmem:[#allocation2 + $0x8] sm:$0xff] %vm174_vm3, %v173_v20  ;;  %v186_v23 = vadd.f32 %v354_v21, %v180_v22 }
 0x186   :  { %v549_v26 = vmax.f32 %v186_v23, 0.0 }
 0x18b   :  { %v181_v24 = vld [vmem:[#allocation2 + $0x8] sm:$0xff] }
 0x18c   :  { %v187_v25 = vadd.f32 %v354_v21, %v181_v24 }
 0x18e   :  { %v551_v27 = vmax.f32 %v187_v25, 0.0 }
 0x190   :  { %v196_v28 = vpack.c.bf16 %v551_v27, %v549_v26 }
 0x192   :  { %241 = vrot.lane.b32.xlu1 %v196_v28, %s485_s6  ;;  %338 = vmatmul.msk.bf16.vlgmr.msra.gmra.mxu2 %vm132_vm2, %v196_v28 }
 0x204   :  { %v242_v29 = vpop.permute.xlu1 %241 }
 0x205   :  { %339 = vmatmul.msk.bf16.vlgmr.msra.gmra.mxu3 %vm132_vm2, %v242_v29 }
 0x215   :  { %v224_v31 = vpop.f32.mrf.mxu2 }
 0x216   :  { %v225_v32 = vadd.f32 %v355_v30, %v224_v31 }
 0x218   :  { %357 = vtanh.f32 %v225_v32 }
 0x21d   :  { %v226_v34 = vpop.f32.mrf.mxu2 }
 0x21e   :  { %v358_v35 = vpop.eup %357  ;;  %v227_v36 = vadd.f32 %v355_v30, %v226_v34 }
 0x21f   :  { %v234_v37 = vmul.f32 %v358_v35, %v356_v33 }
 0x220   :  { %359 = vtanh.f32 %v227_v36 }
 0x221   :  { %236 = vadd.xlane.f32.xlu2 %v234_v37 }
 0x226   :  { %v360_v38 = vpop.eup %359 }
 0x227   :  { %v235_v39 = vmul.f32 %v360_v38, %v356_v33 }
 0x229   :  { %238 = vadd.xlane.f32.xlu2 %v235_v39 }
 0x288   :  { %v255_v40 = vpop.f32.mrf.mxu3 }
 0x289   :  { %v256_v41 = vadd.f32 %v355_v30, %v255_v40 }
 0x28b   :  { %361 = vtanh.f32 %v256_v41 }
 0x290   :  { %v257_v42 = vpop.f32.mrf.mxu3 }
 0x291   :  { %v362_v43 = vpop.eup %361  ;;  %v258_v44 = vadd.f32 %v355_v30, %v257_v42 }
 0x292   :  { %v262_v45 = vmul.f32 %v362_v43, %v356_v33 }
 0x293   :  { %363 = vtanh.f32 %v258_v44 }
 0x294   :  { %264 = vadd.xlane.f32.xlu0 %v262_v45  ;;  %v237_v48 = vpop.xlane.xlu2 %236 }
 0x299   :  { %v364_v46 = vpop.eup %363 }
 0x29a   :  { %v263_v47 = vmul.f32 %v364_v46, %v356_v33 }
 0x29c   :  { %266 = vadd.xlane.f32.xlu1 %v263_v47  ;;  %v239_v55 = vpop.xlane.xlu2 %238 }
 0x307   :  { %v265_v49 = vpop.xlane.xlu0 %264 }
 0x308   :  { %v268_v50 = vmax.f32 %v237_v48, %v265_v49 }
 0x30a   :  { %v270_v51 = vsub.f32 %v237_v48, %v268_v50  ;;  %v276_v52 = vsub.f32 %v265_v49, %v268_v50 }
 0x30c   :  { %v272_v53 = vmul.f32 1.442695, %v270_v51  ;;  %v278_v54 = vmul.f32 1.442695, %v276_v52 }
 0x30e   :  { %365 = vpow2.f32 %v272_v53 }
 0x30f   :  { %367 = vpow2.f32 %v278_v54  ;;  %v267_v56 = vpop.xlane.xlu1 %266 }
 0x310   :  { %v269_v57 = vmax.f32 %v239_v55, %v267_v56 }
 0x312   :  { %v271_v58 = vsub.f32 %v239_v55, %v269_v57  ;;  %v277_v59 = vsub.f32 %v267_v56, %v269_v57 }
 0x314   :  { %v366_v60 = vpop.eup %365  ;;  %v274_v61 = vmul.f32 1.442695, %v271_v58  ;;  %v280_v62 = vmul.f32 1.442695, %v277_v59 }
 0x315   :  { %v368_v63 = vpop.eup %367 }
 0x316   :  { %v282_v0 = vadd.f32 %v368_v63, %v366_v60  ;;  %369 = vpow2.f32 %v274_v61 }
 0x317   :  { %371 = vpow2.f32 %v280_v62 }
 0x318   :  { %373 = vrcp.f32 %v282_v0 }
 0x31c   :  { %v370_v1 = vpop.eup %369 }
 0x31d   :  { %v372_v2 = vpop.eup %371 }
 0x31e   :  { %v374_v3 = vpop.eup %373  ;;  %v283_v4 = vadd.f32 %v372_v2, %v370_v1 }
 0x31f   :  { %v290_v5 = vmul.f32 %v374_v3, %v368_v63  ;;  %v286_v6 = vmul.f32 %v374_v3, %v366_v60 }
 0x320   :  { %375 = vrcp.f32 %v283_v4 }
 0x321   :  { %v292_v7 = vmul.f32 %v290_v5, %v549_v26  ;;  %v288_v12 = vmul.f32 %v286_v6, %v549_v26 }
 0x323   :  { %296 = vrot.lane.b32.xlu2 %v292_v7, %s485_s6 }
 0x326   :  { %v376_v8 = vpop.eup %375 }
 0x327   :  { %v291_v9 = vmul.f32 %v376_v8, %v372_v2  ;;  %v287_v10 = vmul.f32 %v376_v8, %v370_v1 }
 0x329   :  { %v293_v11 = vmul.f32 %v291_v9, %v551_v27  ;;  %v289_v16 = vmul.f32 %v287_v10, %v551_v27 }
 0x32b   :  { %298 = vrot.lane.b32.xlu2 %v293_v11, %s485_s6 }
 0x37d   :  { %v297_v13 = vpop.permute.xlu2 %296 }
 0x37e   :  { %v302_v14 = vadd.f32 %v297_v13, %v288_v12 }
 0x380   :  { %v304_v15 = vpack.c.bf16 %v302_v14, %v302_v14 }
 0x382   :  { %307 = vst.msk [vmem:[%s580_s7] sm:$0xf] %vm306_vm4, %v304_v15 }
 0x385   :  { %v299_v17 = vpop.permute.xlu2 %298 }
 0x386   :  { %v303_v18 = vadd.f32 %v299_v17, %v289_v16 }
 0x388   :  { %v305_v19 = vpack.c.bf16 %v303_v18, %v303_v18 }
 0x38a   :  { %308 = vst.msk [vmem:[%s580_s7 + $0x4] sm:$0xf] %vm306_vm4, %v305_v19 }
 0x38b   :  { %313 = vsyncpa [#allocation4], 1 }
 0x38c   :  { %314 = vsyncpa [#allocation6], 1 }
 0x38d   :  { %315 = vsyncpa [#allocation9], 1 }

// kernel: mgcna_forward.13
= control target key start
LH: loop header
LB: loop body
LE: loop exit
PB: predicated region body
PF: predicated region fallthrough
CT: control target
= control target key end

     0   :  { %s583_s0 = inlined_call_operand.vmem [shape: s32[8,1], index: 0, kind: input, shape index: {}]   ;;  %s584_s1 = inlined_call_operand.vmem [shape: s32[8,1], index: 1, kind: input, shape index: {}]   ;;  %s585_s2 = inlined_call_operand.vmem [shape: bf16[16,32], index: 2, kind: input, shape index: {}]   ;;  %s586_s3 = inlined_call_operand.vmem [shape: bf16[24,32], index: 3, kind: input, shape index: {}]   ;;  %s587_s4 = inlined_call_operand.vmem [shape: bf16[32,64], index: 4, kind: input, shape index: {}]   ;;  %s588_s5 = inlined_call_operand.hbm [shape: bf16[32,64], index: 5, kind: input, shape index: {}]   ;;  %s589_s6 = inlined_call_operand.hbm [shape: bf16[32,64], index: 6, kind: input, shape index: {}]   ;;  %s590_s7 = inlined_call_operand.hbm [shape: bf16[32,64], index: 7, kind: input, shape index: {}]   ;;  %s591_s8 = inlined_call_operand.vmem [shape: f32[1,64], index: 8, kind: input, shape index: {}]   ;;  %s592_s9 = inlined_call_operand.vmem [shape: f32[1,64], index: 9, kind: input, shape index: {}]   ;;  %s593_s10 = inlined_call_operand.<no memory space> [shape: f32[1,1], index: 10, kind: input, shape index: {}]   ;;  %s594_s11 = inlined_call_operand.vmem [shape: f32[8,1], index: 11, kind: output, shape index: {}]  }
   0x1   :  { %v16_v0 = vstv %s593_s10 }
   0x2   :  { %17 = vst [vmem:[#allocation2] sm:$0x1] %v16_v0 }
   0x3   :  { %18 = vsyncpa [#allocation4], 0 }
   0x4   :  { %19 = vsyncpa [#allocation6], 0  ;;  %s47_s21 = sshll.u32 %s589_s6, 4  ;;  %s474_s22 = smov [#allocation5]   ;;  %s48_s21 = int_to_ptr.hbm [resolvable:$true] %s47_s21 }
   0x5   :  { %s49_s23 = sshll.u32 %s474_s22, 4  ;;  %s34_s26 = sshll.u32 %s588_s5, 4  ;;  %s50_s23 = int_to_ptr.vmem [resolvable:$true] %s49_s23  ;;  %s35_s26 = int_to_ptr.hbm [resolvable:$true] %s34_s26 }
   0x6   :  { %s475_s27 = smov 64   ;;  %s476_s28 = smov 4  }
   0x7   :  { %55 = dma.hbm_to_vmem [thread:$0]  %s48_s21, 256, %s50_s23, [#allocation6], %s475_s27, %s475_s27, %s476_s28  }
   0x8   :  { %s477_s10 = smov [#allocation3]   ;;  %s60_s13 = sshll.u32 %s590_s7, 4  ;;  %s61_s13 = int_to_ptr.hbm [resolvable:$true] %s60_s13 }
   0x9   :  { %s36_s29 = sshll.u32 %s477_s10, 4  ;;  %s478_s6 = smov [#allocation7]   ;;  %s37_s29 = int_to_ptr.vmem [resolvable:$true] %s36_s29 }
   0xa   :  { %42 = dma.hbm_to_vmem [thread:$0]  %s35_s26, 256, %s37_s29, [#allocation4], %s475_s27, %s475_s27, %s476_s28  }
   0xb   :  { %s62_s14 = sshll.u32 %s478_s6, 4  ;;  %s63_s14 = int_to_ptr.vmem [resolvable:$true] %s62_s14 }
   0xc   :  { %68 = dma.hbm_to_vmem [thread:$0]  %s61_s13, 256, %s63_s14, [#allocation6], %s475_s27, %s475_s27, %s476_s28  }
   0xd   :  { %470 = dma.done.wait [#allocation4], 256  }
   0xe   :  { %471 = vsyncadd [#allocation4], 4294967040 }
   0xf   :  { %472 = dma.done.wait [#allocation6], 512  }
  0x10   :  { %473 = vsyncadd [#allocation6], 4294966784  ;;  %v479_v1 = vmov 0   ;;  %v90_v2 = vld [vmem:[%s583_s0] sm:$0xff]  ;;  %v133_v5 = vld [vmem:[%s586_s3 + $0x8] sm:$0xf]  ;;  %v88_v11 = vlaneseq }
  0x11   :  { %394 = vset.pattern.permute.xlu0 %v479_v1  ;;  %v98_v3 = vld [vmem:[%s584_s1] sm:$0xff]  ;;  %v139_v6 = vunpack.c.l.b16 %v133_v5  ;;  %vm147_vm0 = vcmask 1043456   ;;  %v480_v14 = vmov 0.0   ;;  %vm114_vm2 = vcmask 130048   ;;  %v383_v20 = vld [vmem:[#allocation5] sm:$0xff]  ;;  %v386_v21 = vld [vmem:[#allocation7 + $0x8] sm:$0xff] }
  0x12   :  { %92 = vperm.xlu0 %394, %v90_v2   ;;  %v377_v4 = vld [vmem:[%s585_s2] sm:$0xff]  ;;  %v89_v12 = vand.u32 127, %v88_v11  ;;  %vm143_vm4 = vcmask 195584   ;;  %v382_v22 = vld [vmem:[#allocation3 + $0x8] sm:$0xff]  ;;  %vm188_vm5 = vcmask 261120   ;;  %vm312_vm6 = vcmask 523264  }
  0x13   :  { %125 = vmatpush.bf16.msra.mxu0 %v377_v4  ;;  %v141_v7 = vpack.c.b16 %v139_v6, %v139_v6  ;;  %v378_v9 = vld [vmem:[%s586_s3] sm:$0xff]  ;;  %v380_v23 = vld [vmem:[%s587_s4 + $0x8] sm:$0xff]  ;;  %198 = vmatpush.bf16.msra.mxu2 %v382_v22  ;;  %vm321_vm7 = vcmask 7168  }
  0x14   :  { %v384_v10 = vld [vmem:[#allocation5 + $0x8] sm:$0xff]  ;;  %226 = vmatpush.bf16.msra.mxu3 %v380_v23  ;;  %v385_v24 = vld [vmem:[#allocation7] sm:$0xff] }
  0x15   :  { %v149_v8 = vsel %vm147_vm0, %v141_v7, 0  ;;  %v381_v25 = vld [vmem:[#allocation3] sm:$0xff]  ;;  %v395_v45 = vld [vmem:[%s591_s8] ss:$0 sm:$0xff] }
  0x16   :  { %157 = vmatpush.bf16.msra.mxu1 %v149_v8  ;;  %v379_v26 = vld [vmem:[%s587_s4] sm:$0xff] }
  0x17   :  { %259 = vmatpush.bf16.msrb.mxu0 %v384_v10  ;;  %199 = vmatpush.bf16.msra.mxu2 %v381_v25  ;;  %v396_v48 = vld [vmem:[%s592_s9] ss:$0 sm:$0xff] }
  0x18   :  { %227 = vmatpush.bf16.msra.mxu3 %v379_v26  ;;  %v397_v54 = vld [vmem:[#allocation2] ss:$0 sm:$0xff] }
  0x1a   :  { %100 = vperm.xlu0 %394, %v98_v3   ;;  %158 = vmatpush.bf16.msra.mxu1 %v378_v9 }
  0x1b   :  { %260 = vmatpush.bf16.msrb.mxu0 %v383_v20 }
  0x1e   :  { %293 = vmatpush.bf16.msrb.mxu1 %v386_v21 }
  0x22   :  { %294 = vmatpush.bf16.msrb.mxu1 %v385_v24 }
  0x84   :  { %v93_v13 = vpop.permute.xlu0 %92 }
  0x85   :  { %vm94_vm1 = vcmp.eq.s32.totalorder %v89_v12, %v93_v13 }
  0x86   :  { %v329_v15 = vsel %vm94_vm1, 1.0, %v480_v14 }
  0x87   :  { %v97_v16 = vpack.c.bf16 %v329_v15, %v329_v15 }
  0x89   :  { %335 = vmatmul.msk.bf16.vlgmr.msra.gmra.mxu0 %vm114_vm2, %v97_v16 }
  0x8c   :  { %v101_v17 = vpop.permute.xlu0 %100 }
  0x8d   :  { %vm102_vm3 = vcmp.eq.s32.totalorder %v89_v12, %v101_v17 }
  0x8e   :  { %v330_v18 = vsel %vm102_vm3, 1.0, %v480_v14 }
  0x8f   :  { %v105_v19 = vpack.c.bf16 %v330_v18, %v330_v18 }
  0x91   :  { %340 = vmatmul.msk.bf16.vlgmr.msra.gmra.mxu1 %vm143_vm4, %v105_v19 }
 0x106   :  { %v127_v27 = vpop.f32.mrf.mxu0 }
 0x107   :  { %v233_v28 = vpack.c.bf16 %v127_v27, %v127_v27 }
 0x109   :  { %367 = vmatmul.msk.bf16.vlgmr.msrb.gmra.mxu0 %vm188_vm5, %v233_v28 }
 0x10e   :  { %v129_v29 = vpop.f32.mrf.mxu0  ;;  %v160_v30 = vpop.f32.mrf.mxu1 }
 0x10f   :  { %v164_v31 = vadd.f32 %v160_v30, %v127_v27  ;;  %v170_v32 = vmul.f32 %v160_v30, %v127_v27  ;;  %v267_v33 = vpack.c.bf16 %v160_v30, %v160_v30 }
 0x111   :  { %376 = vmatmul.msk.bf16.vlgmr.msrb.gmra.mxu1 %vm188_vm5, %v267_v33  ;;  %v171_v34 = vpack.c.bf16 %v170_v32, %v170_v32  ;;  %v165_v35 = vpack.c.bf16 %v164_v31, %v164_v31 }
 0x113   :  { %349 = vmatmul.msk.bf16.vlgmr.msra.gmra.mxu2 %vm188_vm5, %v171_v34  ;;  %358 = vmatmul.msk.bf16.vlgmr.msra.gmra.mxu3 %vm188_vm5, %v165_v35 }
 0x116   :  { %v162_v36 = vpop.f32.mrf.mxu1 }
 0x186   :  { %v262_v37 = vpop.f32.mrf.mxu0 }
 0x18e   :  { %v264_v38 = vpop.f32.mrf.mxu0  ;;  %v296_v39 = vpop.f32.mrf.mxu1 }
 0x196   :  { %v201_v40 = vpop.f32.mrf.mxu2  ;;  %v229_v41 = vpop.f32.mrf.mxu3 }
 0x197   :  { %v230_v42 = vadd.f32 %v229_v41, %v201_v40  ;;  %v298_v43 = vpop.f32.mrf.mxu1 }
 0x199   :  { %v266_v44 = vadd.f32 %v262_v37, %v230_v42 }
 0x19b   :  { %v300_v46 = vadd.f32 %v296_v39, %v266_v44 }
 0x19d   :  { %v305_v47 = vadd.f32 %v395_v45, %v300_v46 }
 0x19e   :  { %v203_v49 = vpop.f32.mrf.mxu2  ;;  %v231_v50 = vpop.f32.mrf.mxu3 }
 0x19f   :  { %v306_v51 = vmax.f32 %v305_v47, 0.0 }
 0x1a1   :  { %v311_v52 = vmul.f32 %v396_v48, %v306_v51 }
 0x1a3   :  { %v313_v53 = vsel %vm312_vm6, %v311_v52, 0.0 }
 0x1a4   :  { %314 = vadd.xlane.f32.xlu1 %v313_v53 }
 0x217   :  { %v315_v55 = vpop.xlane.xlu1 %314 }
 0x218   :  { %v320_v56 = vadd.f32 %v397_v54, %v315_v55 }
 0x21a   :  { %322 = vst.msk [vmem:[%s594_s11] sm:$0xff] %vm321_vm7, %v320_v56 }
 0x21b   :  { %327 = vsyncpa [#allocation4], 1 }
 0x21c   :  { %328 = vsyncpa [#allocation6], 1 }

</bundles_post_ra>
